<compile_context>
chip_gen: v7x
topology: tpu7x:2x2x1
jax: 0.10.0
libtpu: 0.0.40
codegen_flags: <defaults>
</compile_context>

<pallas_src>
import numpy as np
import jax
import jax.numpy as jnp
from jax import lax
from jax.experimental import pallas as pl
from jax.experimental.pallas import tpu as pltpu

INPUT_SIZE = 8
HIDDEN = 50
OUT = 4

HIDDEN_PAD = 128   # lane-aligned hidden size
OUT_PAD = 128      # lane-dense output store (sliced back to 4 in the wrapper)
SUBLANE = 8


def _round_up(n, m):
    return ((n + m - 1) // m) * m


def _make_kernel(T, BBLK, Hp, Op):
    """Kernel closure over static sizes. One grid step handles BBLK batch rows, all T steps."""

    def kernel(x_ref, w_ih_ref, w_hh_ref, b_ref, w_out_ref, b_out_ref,
               y_ref, gx_ref, hs_ref):
        # x_ref:    (T, BBLK, I)   f32     w_ih_ref: (I, 4*Hp)  bf16    w_hh_ref: (Hp, 4*Hp) bf16
        # b_ref:    (1, 4*Hp)      f32     w_out_ref:(Hp, Op)   bf16    b_out_ref:(1, Op)    f32
        # y_ref:    (T, BBLK, Op)  f32 out
        # gx_ref:   (T, BBLK, 4*Hp) f32 VMEM scratch (hoisted input projection)
        # hs_ref:   (T, BBLK, Hp)   bf16 VMEM scratch (per-step hidden states)
        I = x_ref.shape[-1]

        # ---- hoisted input projection: one bulk MXU call, result parked in VMEM scratch ----
        x2 = x_ref[...].reshape(T * BBLK, I).astype(jnp.bfloat16)
        gx = jnp.dot(x2, w_ih_ref[...], preferred_element_type=jnp.float32) + b_ref[...]
        gx_ref[...] = gx.reshape(T, BBLK, 4 * Hp)

        # ---- serial recurrence (only h @ W_hh + elementwise gates per step) ----
        def step(t, carry):
            h, c = carry
            gates = gx_ref[t] + jnp.dot(h.astype(jnp.bfloat16), w_hh_ref[...],
                                        preferred_element_type=jnp.float32)
            # gate layout: [ i | f | o | g ], each Hp lanes (lane-aligned slices)
            sig = jax.nn.sigmoid(gates[:, :3 * Hp])      # one wide EUP push: i, f, o
            g_g = jnp.tanh(gates[:, 3 * Hp:])            # one push: g
            i_g = sig[:, 0 * Hp:1 * Hp]
            f_g = sig[:, 1 * Hp:2 * Hp]
            o_g = sig[:, 2 * Hp:3 * Hp]
            c_n = f_g * c + i_g * g_g
            h_n = o_g * jnp.tanh(c_n)
            hs_ref[t] = h_n.astype(hs_ref.dtype)
            return h_n, c_n

        h0 = jnp.zeros((BBLK, Hp), jnp.float32)
        c0 = jnp.zeros((BBLK, Hp), jnp.float32)
        lax.fori_loop(0, T, step, (h0, c0), unroll=True)

        # ---- hoisted output projection: one bulk matmul + single lane-dense store ----
        hs2 = hs_ref[...].reshape(T * BBLK, Hp)
        y = jnp.dot(hs2, w_out_ref[...], preferred_element_type=jnp.float32) + b_out_ref[...]
        y_ref[...] = y.reshape(T, BBLK, Op).astype(y_ref.dtype)

    return kernel


def _prep_weights(params, Hp, Op):
    """Reorder PyTorch gates (i,f,g,o) -> (i,f,o,g), transpose to right-multiply form,
    zero-pad hidden 50->Hp and output 4->Op, cast matmul operands to bf16 (f32 accumulation)."""
    H = HIDDEN

    def gate_rows(w):  # w: (4H, X) -> i, f, g, o blocks of (H, X)
        return w[0:H], w[H:2 * H], w[2 * H:3 * H], w[3 * H:4 * H]

    gi, gf, gg, go = gate_rows(params["w_ih"])            # each (H, I)
    hi, hf, hg, ho = gate_rows(params["w_hh"])            # each (H, H)
    b_full = params["b_ih"] + params["b_hh"]
    bi, bf_, bg, bo = gate_rows(b_full[:, None])           # each (H, 1)

    pad_c = lambda m: jnp.pad(m, ((0, 0), (0, Hp - H)))            # pad gate (last) axis
    pad_rc = lambda m: jnp.pad(m, ((0, Hp - H), (0, Hp - H)))      # pad h-in rows + gate cols

    # new gate order: i, f, o, g
    w_ih_k = jnp.concatenate([pad_c(gi.T), pad_c(gf.T), pad_c(go.T), pad_c(gg.T)],
                             axis=1).astype(jnp.bfloat16)          # (I, 4Hp)
    w_hh_k = jnp.concatenate([pad_rc(hi.T), pad_rc(hf.T), pad_rc(ho.T), pad_rc(hg.T)],
                             axis=1).astype(jnp.bfloat16)          # (Hp, 4Hp)
    b_k = jnp.concatenate([pad_c(bi.T), pad_c(bf_.T), pad_c(bo.T), pad_c(bg.T)],
                          axis=1)                                  # (1, 4Hp) f32
    w_out_k = jnp.pad(params["w_out"].T,
                      ((0, Hp - H), (0, Op - OUT))).astype(jnp.bfloat16)   # (Hp, Op)
    b_out_k = jnp.pad(params["b_out"][None, :], ((0, 0), (0, Op - OUT)))   # (1, Op) f32
    return w_ih_k, w_hh_k, b_k, w_out_k, b_out_k


@jax.jit
def joint_model_forward(x, params):
    """x: (B, T, INPUT_SIZE) float32, batch_first like the PyTorch module. Returns (B, T, 4)."""
    B, T, I = x.shape
    assert I == INPUT_SIZE
    Hp, Op = HIDDEN_PAD, OUT_PAD

    BBLK = min(256, _round_up(B, SUBLANE))     # batch rows per grid step (sublane multiple)
    Bp = _round_up(B, BBLK)
    n_blk = Bp // BBLK

    # time-major, batch padded to BBLK multiple.
    # TODO(synk): fold this transpose/pad into the BlockSpec index_map to avoid the extra HBM
    #             pass of x once B*T grows (negligible at B=2, T=8).
    x_tm = jnp.transpose(x, (1, 0, 2))                                   # (T, B, I)
    x_tm = jnp.pad(x_tm, ((0, 0), (0, Bp - B), (0, 0)))                  # (T, Bp, I)

    w_ih_k, w_hh_k, b_k, w_out_k, b_out_k = _prep_weights(params, Hp, Op)

    # advisory cost estimate in TRUE (unpadded) units
    H = HIDDEN
    flops = 2 * B * T * (I * 4 * H + H * 4 * H + H * OUT)
    transcendentals = 5 * B * T * H
    bytes_accessed = (4 * (B * T * I + B * T * OUT)
                      + 2 * (w_ih_k.size + w_hh_k.size + w_out_k.size)
                      + 4 * (b_k.size + b_out_k.size))

    y3d = pl.pallas_call(
        _make_kernel(T, BBLK, Hp, Op),
        out_shape=jax.ShapeDtypeStruct((T, Bp, Op), jnp.float32),
        grid=(n_blk,),
        in_specs=[
            pl.BlockSpec((T, BBLK, I), lambda b: (0, b, 0)),             # x (batch-tiled)
            pl.BlockSpec((INPUT_SIZE, 4 * Hp), lambda b: (0, 0)),        # W_ih
            pl.BlockSpec((Hp, 4 * Hp), lambda b: (0, 0)),                # W_hh
            pl.BlockSpec((1, 4 * Hp), lambda b: (0, 0)),                 # b
            pl.BlockSpec((Hp, Op), lambda b: (0, 0)),                    # W_out
            pl.BlockSpec((1, Op), lambda b: (0, 0)),                     # b_out
        ],
        out_specs=pl.BlockSpec((T, BBLK, Op), lambda b: (0, b, 0)),
        scratch_shapes=[
            pltpu.VMEM((T, BBLK, 4 * Hp), jnp.float32),                  # gx (input projection)
            pltpu.VMEM((T, BBLK, Hp), jnp.bfloat16),                     # per-step hidden states
        ],
        compiler_params=pltpu.CompilerParams(
            dimension_semantics=("parallel",),
            vmem_limit_bytes=32 * 1024 * 1024),
        cost_estimate=pl.CostEstimate(flops=flops,
                                      transcendentals=transcendentals,
                                      bytes_accessed=bytes_accessed),
    )(x_tm, w_ih_k, w_hh_k, b_k, w_out_k, b_out_k)

    y = y3d[:, :B, :OUT]                                                 # drop padding
    return jnp.transpose(y, (1, 0, 2))                                   # (B, T, OUT)


def init_params(key):
    """Deterministic init mimicking PyTorch's uniform(-1/sqrt(H), 1/sqrt(H))."""
    k = 1.0 / np.sqrt(HIDDEN)
    keys = jax.random.split(key, 6)
    u = lambda kk, shape: jax.random.uniform(kk, shape, jnp.float32, -k, k)
    return {
        "w_ih": u(keys[0], (4 * HIDDEN, INPUT_SIZE)),
        "w_hh": u(keys[1], (4 * HIDDEN, HIDDEN)),
        "b_ih": u(keys[2], (4 * HIDDEN,)),
        "b_hh": u(keys[3], (4 * HIDDEN,)),
        "w_out": u(keys[4], (OUT, HIDDEN)),
        "b_out": u(keys[5], (OUT,)),
    }


def reference_forward(x, params):
    """Pure-JAX f32 reference of the PyTorch forward (for correctness check)."""
    B, T, _ = x.shape
    H = HIDDEN
    w_ih, w_hh = params["w_ih"], params["w_hh"]
    b_ih, b_hh = params["b_ih"], params["b_hh"]

    def step(carry, x_t):
        h, c = carry
        gates = x_t @ w_ih.T + b_ih + h @ w_hh.T + b_hh
        i = jax.nn.sigmoid(gates[:, 0:H])
        f = jax.nn.sigmoid(gates[:, H:2 * H])
        g = jnp.tanh(gates[:, 2 * H:3 * H])
        o = jax.nn.sigmoid(gates[:, 3 * H:4 * H])
        c = f * c + i * g
        h = o * jnp.tanh(c)
        return (h, c), h

    x_tm = jnp.transpose(x, (1, 0, 2))
    (_, _), hs = lax.scan(step, (jnp.zeros((B, H)), jnp.zeros((B, H))), x_tm)
    y = hs @ params["w_out"].T + params["b_out"]
    return jnp.transpose(y, (1, 0, 2))


if __name__ == "__main__":
    key = jax.random.PRNGKey(0)
    pkey, xkey = jax.random.split(key)
    params = init_params(pkey)

    B, T = 2, 8
    x = jax.random.normal(xkey, (B, T, INPUT_SIZE), jnp.float32)

    y = jax.block_until_ready(joint_model_forward(x, params))
    y_ref = jax.block_until_ready(reference_forward(x, params))

    assert y.shape == (B, T, OUT)
    # bf16 matmul operands (f32 accumulation) -> loosened tolerance vs. the f32 reference.
    np.testing.assert_allclose(np.asarray(y), np.asarray(y_ref), rtol=2e-2, atol=2e-2)
    print("KERNEL_OK")
</pallas_src>

<mosaic_0001>
module attributes {stable_mosaic.version = 11 : i64} {
  func.func @kernel(%arg0: i32, %arg1: memref<8x8x8xf32, #tpu.memory_space<vmem>>, %arg2: memref<8x512xbf16, #tpu.memory_space<vmem>>, %arg3: memref<128x512xbf16, #tpu.memory_space<vmem>>, %arg4: memref<1x512xf32, #tpu.memory_space<vmem>>, %arg5: memref<128x128xbf16, #tpu.memory_space<vmem>>, %arg6: memref<1x128xf32, #tpu.memory_space<vmem>>, %arg7: memref<8x8x128xf32, #tpu.memory_space<vmem>>, %arg8: memref<8x8x512xf32, #tpu.memory_space<vmem>>, %arg9: memref<8x8x128xbf16, #tpu.memory_space<vmem>>) attributes {dimension_semantics = [#tpu.dimension_semantics<parallel>], iteration_bounds = array<i64: 1>, scalar_prefetch = 0 : i64, scratch_operands = 2 : i64, tpu.core_type = #tpu.core_type<tc>, window_params = [{transform_indices = @transform_0, window_bounds = array<i64: 8, 8, 8>}, {pipeline_mode = #tpu.pipeline_mode<synchronous>, transform_indices = @transform_1, window_bounds = array<i64: 8, 512>}, {pipeline_mode = #tpu.pipeline_mode<synchronous>, transform_indices = @transform_2, window_bounds = array<i64: 128, 512>}, {pipeline_mode = #tpu.pipeline_mode<synchronous>, transform_indices = @transform_3, window_bounds = array<i64: 1, 512>}, {pipeline_mode = #tpu.pipeline_mode<synchronous>, transform_indices = @transform_4, window_bounds = array<i64: 128, 128>}, {pipeline_mode = #tpu.pipeline_mode<synchronous>, transform_indices = @transform_5, window_bounds = array<i64: 1, 128>}, {transform_indices = @transform_6, window_bounds = array<i64: 8, 8, 128>}]} {
    %c0 = arith.constant 0 : index
    %c0_0 = arith.constant 0 : index
    %c0_1 = arith.constant 0 : index
    %0 = vector.load %arg1[%c0, %c0_0, %c0_1] : memref<8x8x8xf32, #tpu.memory_space<vmem>>, vector<8x8x8xf32>
    %1 = vector.shape_cast %0 : vector<8x8x8xf32> to vector<64x8xf32>
    %2 = arith.truncf %1 : vector<64x8xf32> to vector<64x8xbf16>
    %c0_2 = arith.constant 0 : index
    %c0_3 = arith.constant 0 : index
    %3 = vector.load %arg2[%c0_2, %c0_3] : memref<8x512xbf16, #tpu.memory_space<vmem>>, vector<8x512xbf16>
    %cst = arith.constant dense<0.000000e+00> : vector<64x512xf32>
    %4 = tpu.matmul %2, %3, %cst {dimension_numbers = #tpu.dot_dimension_numbers<[1], [0], [0], [1], [0, 0, 1, 1], [], []>} : vector<64x8xbf16>, vector<8x512xbf16>, vector<64x512xf32> -> vector<64x512xf32>
    %c0_4 = arith.constant 0 : index
    %c0_5 = arith.constant 0 : index
    %5 = vector.load %arg4[%c0_4, %c0_5] : memref<1x512xf32, #tpu.memory_space<vmem>>, vector<1x512xf32>
    %6 = vector.broadcast %5 : vector<1x512xf32> to vector<64x512xf32>
    %7 = arith.addf %4, %6 : vector<64x512xf32>
    %8 = vector.shape_cast %7 : vector<64x512xf32> to vector<8x8x512xf32>
    %c0_6 = arith.constant 0 : index
    %c0_7 = arith.constant 0 : index
    %c0_8 = arith.constant 0 : index
    %9 = vector.load %arg8[%c0_6, %c0_7, %c0_8] : memref<8x8x512xf32, #tpu.memory_space<vmem>>, vector<8x8x512xf32>
    tpu.vector_store %arg8[%c0_6, %c0_7, %c0_8], %8 {strides = array<i32>} : memref<8x8x512xf32, #tpu.memory_space<vmem>>, vector<8x8x512xf32>,
    %cst_9 = arith.constant 0.000000e+00 : f32
    %10 = vector.broadcast %cst_9 : f32 to vector<8x128xf32>
    %cst_10 = arith.constant 0.000000e+00 : f32
    %11 = vector.broadcast %cst_10 : f32 to vector<8x128xf32>
    %c0_i32 = arith.constant 0 : i32
    %12 = arith.index_cast %c0_i32 : i32 to index
    %c0_11 = arith.constant 0 : index
    %c0_12 = arith.constant 0 : index
    %13 = vector.load %arg8[%12, %c0_11, %c0_12] : memref<8x8x512xf32, #tpu.memory_space<vmem>>, vector<1x8x512xf32>
    %14 = vector.shape_cast %13 : vector<1x8x512xf32> to vector<8x512xf32>
    %15 = arith.truncf %10 : vector<8x128xf32> to vector<8x128xbf16>
    %c0_13 = arith.constant 0 : index
    %c0_14 = arith.constant 0 : index
    %16 = vector.load %arg3[%c0_13, %c0_14] : memref<128x512xbf16, #tpu.memory_space<vmem>>, vector<128x512xbf16>
    %cst_15 = arith.constant dense<0.000000e+00> : vector<8x512xf32>
    %17 = tpu.matmul %15, %16, %cst_15 {dimension_numbers = #tpu.dot_dimension_numbers<[1], [0], [0], [1], [0, 0, 1, 1], [], []>} : vector<8x128xbf16>, vector<128x512xbf16>, vector<8x512xf32> -> vector<8x512xf32>
    %18 = arith.addf %14, %17 : vector<8x512xf32>
    %19 = vector.extract_strided_slice %18 {offsets = [0, 0], sizes = [8, 384], strides = [1, 1]} : vector<8x512xf32> to vector<8x384xf32>
    %20 = arith.negf %19 : vector<8x384xf32>
    %21 = math.exp %20 : vector<8x384xf32>
    %cst_16 = arith.constant 1.000000e+00 : f32
    %22 = vector.broadcast %cst_16 : f32 to vector<8x384xf32>
    %23 = arith.addf %22, %21 : vector<8x384xf32>
    %24 = arith.divf %22, %23 : vector<8x384xf32>
    %25 = vector.extract_strided_slice %18 {offsets = [0, 384], sizes = [8, 128], strides = [1, 1]} : vector<8x512xf32> to vector<8x128xf32>
    %26 = math.tanh %25 : vector<8x128xf32>
    %27 = vector.extract_strided_slice %24 {offsets = [0, 0], sizes = [8, 128], strides = [1, 1]} : vector<8x384xf32> to vector<8x128xf32>
    %28 = vector.extract_strided_slice %24 {offsets = [0, 128], sizes = [8, 128], strides = [1, 1]} : vector<8x384xf32> to vector<8x128xf32>
    %29 = vector.extract_strided_slice %24 {offsets = [0, 256], sizes = [8, 128], strides = [1, 1]} : vector<8x384xf32> to vector<8x128xf32>
    %30 = arith.mulf %28, %11 : vector<8x128xf32>
    %31 = arith.mulf %27, %26 : vector<8x128xf32>
    %32 = arith.addf %30, %31 : vector<8x128xf32>
    %33 = math.tanh %32 : vector<8x128xf32>
    %34 = arith.mulf %29, %33 : vector<8x128xf32>
    %35 = arith.truncf %34 : vector<8x128xf32> to vector<8x128xbf16>
    %36 = arith.index_cast %c0_i32 : i32 to index
    %c0_17 = arith.constant 0 : index
    %c0_18 = arith.constant 0 : index
    %37 = vector.load %arg9[%36, %c0_17, %c0_18] : memref<8x8x128xbf16, #tpu.memory_space<vmem>>, vector<1x8x128xbf16>
    %38 = vector.shape_cast %37 : vector<1x8x128xbf16> to vector<8x128xbf16>
    %39 = vector.shape_cast %35 : vector<8x128xbf16> to vector<1x8x128xbf16>
    tpu.vector_store %arg9[%36, %c0_17, %c0_18], %39 {strides = array<i32>} : memref<8x8x128xbf16, #tpu.memory_space<vmem>>, vector<1x8x128xbf16>,
    %c1_i32 = arith.constant 1 : i32
    %40 = arith.index_cast %c1_i32 : i32 to index
    %c0_19 = arith.constant 0 : index
    %c0_20 = arith.constant 0 : index
    %41 = vector.load %arg8[%40, %c0_19, %c0_20] : memref<8x8x512xf32, #tpu.memory_space<vmem>>, vector<1x8x512xf32>
    %42 = vector.shape_cast %41 : vector<1x8x512xf32> to vector<8x512xf32>
    %43 = arith.truncf %34 : vector<8x128xf32> to vector<8x128xbf16>
    %c0_21 = arith.constant 0 : index
    %c0_22 = arith.constant 0 : index
    %44 = vector.load %arg3[%c0_21, %c0_22] : memref<128x512xbf16, #tpu.memory_space<vmem>>, vector<128x512xbf16>
    %cst_23 = arith.constant dense<0.000000e+00> : vector<8x512xf32>
    %45 = tpu.matmul %43, %44, %cst_23 {dimension_numbers = #tpu.dot_dimension_numbers<[1], [0], [0], [1], [0, 0, 1, 1], [], []>} : vector<8x128xbf16>, vector<128x512xbf16>, vector<8x512xf32> -> vector<8x512xf32>
    %46 = arith.addf %42, %45 : vector<8x512xf32>
    %47 = vector.extract_strided_slice %46 {offsets = [0, 0], sizes = [8, 384], strides = [1, 1]} : vector<8x512xf32> to vector<8x384xf32>
    %48 = arith.negf %47 : vector<8x384xf32>
    %49 = math.exp %48 : vector<8x384xf32>
    %cst_24 = arith.constant 1.000000e+00 : f32
    %50 = vector.broadcast %cst_24 : f32 to vector<8x384xf32>
    %51 = arith.addf %50, %49 : vector<8x384xf32>
    %52 = arith.divf %50, %51 : vector<8x384xf32>
    %53 = vector.extract_strided_slice %46 {offsets = [0, 384], sizes = [8, 128], strides = [1, 1]} : vector<8x512xf32> to vector<8x128xf32>
    %54 = math.tanh %53 : vector<8x128xf32>
    %55 = vector.extract_strided_slice %52 {offsets = [0, 0], sizes = [8, 128], strides = [1, 1]} : vector<8x384xf32> to vector<8x128xf32>
    %56 = vector.extract_strided_slice %52 {offsets = [0, 128], sizes = [8, 128], strides = [1, 1]} : vector<8x384xf32> to vector<8x128xf32>
    %57 = vector.extract_strided_slice %52 {offsets = [0, 256], sizes = [8, 128], strides = [1, 1]} : vector<8x384xf32> to vector<8x128xf32>
    %58 = arith.mulf %56, %32 : vector<8x128xf32>
    %59 = arith.mulf %55, %54 : vector<8x128xf32>
    %60 = arith.addf %58, %59 : vector<8x128xf32>
    %61 = math.tanh %60 : vector<8x128xf32>
    %62 = arith.mulf %57, %61 : vector<8x128xf32>
    %63 = arith.truncf %62 : vector<8x128xf32> to vector<8x128xbf16>
    %64 = arith.index_cast %c1_i32 : i32 to index
    %c0_25 = arith.constant 0 : index
    %c0_26 = arith.constant 0 : index
    %65 = vector.load %arg9[%64, %c0_25, %c0_26] : memref<8x8x128xbf16, #tpu.memory_space<vmem>>, vector<1x8x128xbf16>
    %66 = vector.shape_cast %65 : vector<1x8x128xbf16> to vector<8x128xbf16>
    %67 = vector.shape_cast %63 : vector<8x128xbf16> to vector<1x8x128xbf16>
    tpu.vector_store %arg9[%64, %c0_25, %c0_26], %67 {strides = array<i32>} : memref<8x8x128xbf16, #tpu.memory_space<vmem>>, vector<1x8x128xbf16>,
    %c2_i32 = arith.constant 2 : i32
    %68 = arith.index_cast %c2_i32 : i32 to index
    %c0_27 = arith.constant 0 : index
    %c0_28 = arith.constant 0 : index
    %69 = vector.load %arg8[%68, %c0_27, %c0_28] : memref<8x8x512xf32, #tpu.memory_space<vmem>>, vector<1x8x512xf32>
    %70 = vector.shape_cast %69 : vector<1x8x512xf32> to vector<8x512xf32>
    %71 = arith.truncf %62 : vector<8x128xf32> to vector<8x128xbf16>
    %c0_29 = arith.constant 0 : index
    %c0_30 = arith.constant 0 : index
    %72 = vector.load %arg3[%c0_29, %c0_30] : memref<128x512xbf16, #tpu.memory_space<vmem>>, vector<128x512xbf16>
    %cst_31 = arith.constant dense<0.000000e+00> : vector<8x512xf32>
    %73 = tpu.matmul %71, %72, %cst_31 {dimension_numbers = #tpu.dot_dimension_numbers<[1], [0], [0], [1], [0, 0, 1, 1], [], []>} : vector<8x128xbf16>, vector<128x512xbf16>, vector<8x512xf32> -> vector<8x512xf32>
    %74 = arith.addf %70, %73 : vector<8x512xf32>
    %75 = vector.extract_strided_slice %74 {offsets = [0, 0], sizes = [8, 384], strides = [1, 1]} : vector<8x512xf32> to vector<8x384xf32>
    %76 = arith.negf %75 : vector<8x384xf32>
    %77 = math.exp %76 : vector<8x384xf32>
    %cst_32 = arith.constant 1.000000e+00 : f32
    %78 = vector.broadcast %cst_32 : f32 to vector<8x384xf32>
    %79 = arith.addf %78, %77 : vector<8x384xf32>
    %80 = arith.divf %78, %79 : vector<8x384xf32>
    %81 = vector.extract_strided_slice %74 {offsets = [0, 384], sizes = [8, 128], strides = [1, 1]} : vector<8x512xf32> to vector<8x128xf32>
    %82 = math.tanh %81 : vector<8x128xf32>
    %83 = vector.extract_strided_slice %80 {offsets = [0, 0], sizes = [8, 128], strides = [1, 1]} : vector<8x384xf32> to vector<8x128xf32>
    %84 = vector.extract_strided_slice %80 {offsets = [0, 128], sizes = [8, 128], strides = [1, 1]} : vector<8x384xf32> to vector<8x128xf32>
    %85 = vector.extract_strided_slice %80 {offsets = [0, 256], sizes = [8, 128], strides = [1, 1]} : vector<8x384xf32> to vector<8x128xf32>
    %86 = arith.mulf %84, %60 : vector<8x128xf32>
    %87 = arith.mulf %83, %82 : vector<8x128xf32>
    %88 = arith.addf %86, %87 : vector<8x128xf32>
    %89 = math.tanh %88 : vector<8x128xf32>
    %90 = arith.mulf %85, %89 : vector<8x128xf32>
    %91 = arith.truncf %90 : vector<8x128xf32> to vector<8x128xbf16>
    %92 = arith.index_cast %c2_i32 : i32 to index
    %c0_33 = arith.constant 0 : index
    %c0_34 = arith.constant 0 : index
    %93 = vector.load %arg9[%92, %c0_33, %c0_34] : memref<8x8x128xbf16, #tpu.memory_space<vmem>>, vector<1x8x128xbf16>
    %94 = vector.shape_cast %93 : vector<1x8x128xbf16> to vector<8x128xbf16>
    %95 = vector.shape_cast %91 : vector<8x128xbf16> to vector<1x8x128xbf16>
    tpu.vector_store %arg9[%92, %c0_33, %c0_34], %95 {strides = array<i32>} : memref<8x8x128xbf16, #tpu.memory_space<vmem>>, vector<1x8x128xbf16>,
    %c3_i32 = arith.constant 3 : i32
    %96 = arith.index_cast %c3_i32 : i32 to index
    %c0_35 = arith.constant 0 : index
    %c0_36 = arith.constant 0 : index
    %97 = vector.load %arg8[%96, %c0_35, %c0_36] : memref<8x8x512xf32, #tpu.memory_space<vmem>>, vector<1x8x512xf32>
    %98 = vector.shape_cast %97 : vector<1x8x512xf32> to vector<8x512xf32>
    %99 = arith.truncf %90 : vector<8x128xf32> to vector<8x128xbf16>
    %c0_37 = arith.constant 0 : index
    %c0_38 = arith.constant 0 : index
    %100 = vector.load %arg3[%c0_37, %c0_38] : memref<128x512xbf16, #tpu.memory_space<vmem>>, vector<128x512xbf16>
    %cst_39 = arith.constant dense<0.000000e+00> : vector<8x512xf32>
    %101 = tpu.matmul %99, %100, %cst_39 {dimension_numbers = #tpu.dot_dimension_numbers<[1], [0], [0], [1], [0, 0, 1, 1], [], []>} : vector<8x128xbf16>, vector<128x512xbf16>, vector<8x512xf32> -> vector<8x512xf32>
    %102 = arith.addf %98, %101 : vector<8x512xf32>
    %103 = vector.extract_strided_slice %102 {offsets = [0, 0], sizes = [8, 384], strides = [1, 1]} : vector<8x512xf32> to vector<8x384xf32>
    %104 = arith.negf %103 : vector<8x384xf32>
    %105 = math.exp %104 : vector<8x384xf32>
    %cst_40 = arith.constant 1.000000e+00 : f32
    %106 = vector.broadcast %cst_40 : f32 to vector<8x384xf32>
    %107 = arith.addf %106, %105 : vector<8x384xf32>
    %108 = arith.divf %106, %107 : vector<8x384xf32>
    %109 = vector.extract_strided_slice %102 {offsets = [0, 384], sizes = [8, 128], strides = [1, 1]} : vector<8x512xf32> to vector<8x128xf32>
    %110 = math.tanh %109 : vector<8x128xf32>
    %111 = vector.extract_strided_slice %108 {offsets = [0, 0], sizes = [8, 128], strides = [1, 1]} : vector<8x384xf32> to vector<8x128xf32>
    %112 = vector.extract_strided_slice %108 {offsets = [0, 128], sizes = [8, 128], strides = [1, 1]} : vector<8x384xf32> to vector<8x128xf32>
    %113 = vector.extract_strided_slice %108 {offsets = [0, 256], sizes = [8, 128], strides = [1, 1]} : vector<8x384xf32> to vector<8x128xf32>
    %114 = arith.mulf %112, %88 : vector<8x128xf32>
    %115 = arith.mulf %111, %110 : vector<8x128xf32>
    %116 = arith.addf %114, %115 : vector<8x128xf32>
    %117 = math.tanh %116 : vector<8x128xf32>
    %118 = arith.mulf %113, %117 : vector<8x128xf32>
    %119 = arith.truncf %118 : vector<8x128xf32> to vector<8x128xbf16>
    %120 = arith.index_cast %c3_i32 : i32 to index
    %c0_41 = arith.constant 0 : index
    %c0_42 = arith.constant 0 : index
    %121 = vector.load %arg9[%120, %c0_41, %c0_42] : memref<8x8x128xbf16, #tpu.memory_space<vmem>>, vector<1x8x128xbf16>
    %122 = vector.shape_cast %121 : vector<1x8x128xbf16> to vector<8x128xbf16>
    %123 = vector.shape_cast %119 : vector<8x128xbf16> to vector<1x8x128xbf16>
    tpu.vector_store %arg9[%120, %c0_41, %c0_42], %123 {strides = array<i32>} : memref<8x8x128xbf16, #tpu.memory_space<vmem>>, vector<1x8x128xbf16>,
    %c4_i32 = arith.constant 4 : i32
    %124 = arith.index_cast %c4_i32 : i32 to index
    %c0_43 = arith.constant 0 : index
    %c0_44 = arith.constant 0 : index
    %125 = vector.load %arg8[%124, %c0_43, %c0_44] : memref<8x8x512xf32, #tpu.memory_space<vmem>>, vector<1x8x512xf32>
    %126 = vector.shape_cast %125 : vector<1x8x512xf32> to vector<8x512xf32>
    %127 = arith.truncf %118 : vector<8x128xf32> to vector<8x128xbf16>
    %c0_45 = arith.constant 0 : index
    %c0_46 = arith.constant 0 : index
    %128 = vector.load %arg3[%c0_45, %c0_46] : memref<128x512xbf16, #tpu.memory_space<vmem>>, vector<128x512xbf16>
    %cst_47 = arith.constant dense<0.000000e+00> : vector<8x512xf32>
    %129 = tpu.matmul %127, %128, %cst_47 {dimension_numbers = #tpu.dot_dimension_numbers<[1], [0], [0], [1], [0, 0, 1, 1], [], []>} : vector<8x128xbf16>, vector<128x512xbf16>, vector<8x512xf32> -> vector<8x512xf32>
    %130 = arith.addf %126, %129 : vector<8x512xf32>
    %131 = vector.extract_strided_slice %130 {offsets = [0, 0], sizes = [8, 384], strides = [1, 1]} : vector<8x512xf32> to vector<8x384xf32>
    %132 = arith.negf %131 : vector<8x384xf32>
    %133 = math.exp %132 : vector<8x384xf32>
    %cst_48 = arith.constant 1.000000e+00 : f32
    %134 = vector.broadcast %cst_48 : f32 to vector<8x384xf32>
    %135 = arith.addf %134, %133 : vector<8x384xf32>
    %136 = arith.divf %134, %135 : vector<8x384xf32>
    %137 = vector.extract_strided_slice %130 {offsets = [0, 384], sizes = [8, 128], strides = [1, 1]} : vector<8x512xf32> to vector<8x128xf32>
    %138 = math.tanh %137 : vector<8x128xf32>
    %139 = vector.extract_strided_slice %136 {offsets = [0, 0], sizes = [8, 128], strides = [1, 1]} : vector<8x384xf32> to vector<8x128xf32>
    %140 = vector.extract_strided_slice %136 {offsets = [0, 128], sizes = [8, 128], strides = [1, 1]} : vector<8x384xf32> to vector<8x128xf32>
    %141 = vector.extract_strided_slice %136 {offsets = [0, 256], sizes = [8, 128], strides = [1, 1]} : vector<8x384xf32> to vector<8x128xf32>
    %142 = arith.mulf %140, %116 : vector<8x128xf32>
    %143 = arith.mulf %139, %138 : vector<8x128xf32>
    %144 = arith.addf %142, %143 : vector<8x128xf32>
    %145 = math.tanh %144 : vector<8x128xf32>
    %146 = arith.mulf %141, %145 : vector<8x128xf32>
    %147 = arith.truncf %146 : vector<8x128xf32> to vector<8x128xbf16>
    %148 = arith.index_cast %c4_i32 : i32 to index
    %c0_49 = arith.constant 0 : index
    %c0_50 = arith.constant 0 : index
    %149 = vector.load %arg9[%148, %c0_49, %c0_50] : memref<8x8x128xbf16, #tpu.memory_space<vmem>>, vector<1x8x128xbf16>
    %150 = vector.shape_cast %149 : vector<1x8x128xbf16> to vector<8x128xbf16>
    %151 = vector.shape_cast %147 : vector<8x128xbf16> to vector<1x8x128xbf16>
    tpu.vector_store %arg9[%148, %c0_49, %c0_50], %151 {strides = array<i32>} : memref<8x8x128xbf16, #tpu.memory_space<vmem>>, vector<1x8x128xbf16>,
    %c5_i32 = arith.constant 5 : i32
    %152 = arith.index_cast %c5_i32 : i32 to index
    %c0_51 = arith.constant 0 : index
    %c0_52 = arith.constant 0 : index
    %153 = vector.load %arg8[%152, %c0_51, %c0_52] : memref<8x8x512xf32, #tpu.memory_space<vmem>>, vector<1x8x512xf32>
    %154 = vector.shape_cast %153 : vector<1x8x512xf32> to vector<8x512xf32>
    %155 = arith.truncf %146 : vector<8x128xf32> to vector<8x128xbf16>
    %c0_53 = arith.constant 0 : index
    %c0_54 = arith.constant 0 : index
    %156 = vector.load %arg3[%c0_53, %c0_54] : memref<128x512xbf16, #tpu.memory_space<vmem>>, vector<128x512xbf16>
    %cst_55 = arith.constant dense<0.000000e+00> : vector<8x512xf32>
    %157 = tpu.matmul %155, %156, %cst_55 {dimension_numbers = #tpu.dot_dimension_numbers<[1], [0], [0], [1], [0, 0, 1, 1], [], []>} : vector<8x128xbf16>, vector<128x512xbf16>, vector<8x512xf32> -> vector<8x512xf32>
    %158 = arith.addf %154, %157 : vector<8x512xf32>
    %159 = vector.extract_strided_slice %158 {offsets = [0, 0], sizes = [8, 384], strides = [1, 1]} : vector<8x512xf32> to vector<8x384xf32>
    %160 = arith.negf %159 : vector<8x384xf32>
    %161 = math.exp %160 : vector<8x384xf32>
    %cst_56 = arith.constant 1.000000e+00 : f32
    %162 = vector.broadcast %cst_56 : f32 to vector<8x384xf32>
    %163 = arith.addf %162, %161 : vector<8x384xf32>
    %164 = arith.divf %162, %163 : vector<8x384xf32>
    %165 = vector.extract_strided_slice %158 {offsets = [0, 384], sizes = [8, 128], strides = [1, 1]} : vector<8x512xf32> to vector<8x128xf32>
    %166 = math.tanh %165 : vector<8x128xf32>
    %167 = vector.extract_strided_slice %164 {offsets = [0, 0], sizes = [8, 128], strides = [1, 1]} : vector<8x384xf32> to vector<8x128xf32>
    %168 = vector.extract_strided_slice %164 {offsets = [0, 128], sizes = [8, 128], strides = [1, 1]} : vector<8x384xf32> to vector<8x128xf32>
    %169 = vector.extract_strided_slice %164 {offsets = [0, 256], sizes = [8, 128], strides = [1, 1]} : vector<8x384xf32> to vector<8x128xf32>
    %170 = arith.mulf %168, %144 : vector<8x128xf32>
    %171 = arith.mulf %167, %166 : vector<8x128xf32>
    %172 = arith.addf %170, %171 : vector<8x128xf32>
    %173 = math.tanh %172 : vector<8x128xf32>
    %174 = arith.mulf %169, %173 : vector<8x128xf32>
    %175 = arith.truncf %174 : vector<8x128xf32> to vector<8x128xbf16>
    %176 = arith.index_cast %c5_i32 : i32 to index
    %c0_57 = arith.constant 0 : index
    %c0_58 = arith.constant 0 : index
    %177 = vector.load %arg9[%176, %c0_57, %c0_58] : memref<8x8x128xbf16, #tpu.memory_space<vmem>>, vector<1x8x128xbf16>
    %178 = vector.shape_cast %177 : vector<1x8x128xbf16> to vector<8x128xbf16>
    %179 = vector.shape_cast %175 : vector<8x128xbf16> to vector<1x8x128xbf16>
    tpu.vector_store %arg9[%176, %c0_57, %c0_58], %179 {strides = array<i32>} : memref<8x8x128xbf16, #tpu.memory_space<vmem>>, vector<1x8x128xbf16>,
    %c6_i32 = arith.constant 6 : i32
    %180 = arith.index_cast %c6_i32 : i32 to index
    %c0_59 = arith.constant 0 : index
    %c0_60 = arith.constant 0 : index
    %181 = vector.load %arg8[%180, %c0_59, %c0_60] : memref<8x8x512xf32, #tpu.memory_space<vmem>>, vector<1x8x512xf32>
    %182 = vector.shape_cast %181 : vector<1x8x512xf32> to vector<8x512xf32>
    %183 = arith.truncf %174 : vector<8x128xf32> to vector<8x128xbf16>
    %c0_61 = arith.constant 0 : index
    %c0_62 = arith.constant 0 : index
    %184 = vector.load %arg3[%c0_61, %c0_62] : memref<128x512xbf16, #tpu.memory_space<vmem>>, vector<128x512xbf16>
    %cst_63 = arith.constant dense<0.000000e+00> : vector<8x512xf32>
    %185 = tpu.matmul %183, %184, %cst_63 {dimension_numbers = #tpu.dot_dimension_numbers<[1], [0], [0], [1], [0, 0, 1, 1], [], []>} : vector<8x128xbf16>, vector<128x512xbf16>, vector<8x512xf32> -> vector<8x512xf32>
    %186 = arith.addf %182, %185 : vector<8x512xf32>
    %187 = vector.extract_strided_slice %186 {offsets = [0, 0], sizes = [8, 384], strides = [1, 1]} : vector<8x512xf32> to vector<8x384xf32>
    %188 = arith.negf %187 : vector<8x384xf32>
    %189 = math.exp %188 : vector<8x384xf32>
    %cst_64 = arith.constant 1.000000e+00 : f32
    %190 = vector.broadcast %cst_64 : f32 to vector<8x384xf32>
    %191 = arith.addf %190, %189 : vector<8x384xf32>
    %192 = arith.divf %190, %191 : vector<8x384xf32>
    %193 = vector.extract_strided_slice %186 {offsets = [0, 384], sizes = [8, 128], strides = [1, 1]} : vector<8x512xf32> to vector<8x128xf32>
    %194 = math.tanh %193 : vector<8x128xf32>
    %195 = vector.extract_strided_slice %192 {offsets = [0, 0], sizes = [8, 128], strides = [1, 1]} : vector<8x384xf32> to vector<8x128xf32>
    %196 = vector.extract_strided_slice %192 {offsets = [0, 128], sizes = [8, 128], strides = [1, 1]} : vector<8x384xf32> to vector<8x128xf32>
    %197 = vector.extract_strided_slice %192 {offsets = [0, 256], sizes = [8, 128], strides = [1, 1]} : vector<8x384xf32> to vector<8x128xf32>
    %198 = arith.mulf %196, %172 : vector<8x128xf32>
    %199 = arith.mulf %195, %194 : vector<8x128xf32>
    %200 = arith.addf %198, %199 : vector<8x128xf32>
    %201 = math.tanh %200 : vector<8x128xf32>
    %202 = arith.mulf %197, %201 : vector<8x128xf32>
    %203 = arith.truncf %202 : vector<8x128xf32> to vector<8x128xbf16>
    %204 = arith.index_cast %c6_i32 : i32 to index
    %c0_65 = arith.constant 0 : index
    %c0_66 = arith.constant 0 : index
    %205 = vector.load %arg9[%204, %c0_65, %c0_66] : memref<8x8x128xbf16, #tpu.memory_space<vmem>>, vector<1x8x128xbf16>
    %206 = vector.shape_cast %205 : vector<1x8x128xbf16> to vector<8x128xbf16>
    %207 = vector.shape_cast %203 : vector<8x128xbf16> to vector<1x8x128xbf16>
    tpu.vector_store %arg9[%204, %c0_65, %c0_66], %207 {strides = array<i32>} : memref<8x8x128xbf16, #tpu.memory_space<vmem>>, vector<1x8x128xbf16>,
    %c7_i32 = arith.constant 7 : i32
    %208 = arith.index_cast %c7_i32 : i32 to index
    %c0_67 = arith.constant 0 : index
    %c0_68 = arith.constant 0 : index
    %209 = vector.load %arg8[%208, %c0_67, %c0_68] : memref<8x8x512xf32, #tpu.memory_space<vmem>>, vector<1x8x512xf32>
    %210 = vector.shape_cast %209 : vector<1x8x512xf32> to vector<8x512xf32>
    %211 = arith.truncf %202 : vector<8x128xf32> to vector<8x128xbf16>
    %c0_69 = arith.constant 0 : index
    %c0_70 = arith.constant 0 : index
    %212 = vector.load %arg3[%c0_69, %c0_70] : memref<128x512xbf16, #tpu.memory_space<vmem>>, vector<128x512xbf16>
    %cst_71 = arith.constant dense<0.000000e+00> : vector<8x512xf32>
    %213 = tpu.matmul %211, %212, %cst_71 {dimension_numbers = #tpu.dot_dimension_numbers<[1], [0], [0], [1], [0, 0, 1, 1], [], []>} : vector<8x128xbf16>, vector<128x512xbf16>, vector<8x512xf32> -> vector<8x512xf32>
    %214 = arith.addf %210, %213 : vector<8x512xf32>
    %215 = vector.extract_strided_slice %214 {offsets = [0, 0], sizes = [8, 384], strides = [1, 1]} : vector<8x512xf32> to vector<8x384xf32>
    %216 = arith.negf %215 : vector<8x384xf32>
    %217 = math.exp %216 : vector<8x384xf32>
    %cst_72 = arith.constant 1.000000e+00 : f32
    %218 = vector.broadcast %cst_72 : f32 to vector<8x384xf32>
    %219 = arith.addf %218, %217 : vector<8x384xf32>
    %220 = arith.divf %218, %219 : vector<8x384xf32>
    %221 = vector.extract_strided_slice %214 {offsets = [0, 384], sizes = [8, 128], strides = [1, 1]} : vector<8x512xf32> to vector<8x128xf32>
    %222 = math.tanh %221 : vector<8x128xf32>
    %223 = vector.extract_strided_slice %220 {offsets = [0, 0], sizes = [8, 128], strides = [1, 1]} : vector<8x384xf32> to vector<8x128xf32>
    %224 = vector.extract_strided_slice %220 {offsets = [0, 128], sizes = [8, 128], strides = [1, 1]} : vector<8x384xf32> to vector<8x128xf32>
    %225 = vector.extract_strided_slice %220 {offsets = [0, 256], sizes = [8, 128], strides = [1, 1]} : vector<8x384xf32> to vector<8x128xf32>
    %226 = arith.mulf %224, %200 : vector<8x128xf32>
    %227 = arith.mulf %223, %222 : vector<8x128xf32>
    %228 = arith.addf %226, %227 : vector<8x128xf32>
    %229 = math.tanh %228 : vector<8x128xf32>
    %230 = arith.mulf %225, %229 : vector<8x128xf32>
    %231 = arith.truncf %230 : vector<8x128xf32> to vector<8x128xbf16>
    %232 = arith.index_cast %c7_i32 : i32 to index
    %c0_73 = arith.constant 0 : index
    %c0_74 = arith.constant 0 : index
    %233 = vector.load %arg9[%232, %c0_73, %c0_74] : memref<8x8x128xbf16, #tpu.memory_space<vmem>>, vector<1x8x128xbf16>
    %234 = vector.shape_cast %233 : vector<1x8x128xbf16> to vector<8x128xbf16>
    %235 = vector.shape_cast %231 : vector<8x128xbf16> to vector<1x8x128xbf16>
    tpu.vector_store %arg9[%232, %c0_73, %c0_74], %235 {strides = array<i32>} : memref<8x8x128xbf16, #tpu.memory_space<vmem>>, vector<1x8x128xbf16>,
    %c8_i32 = arith.constant 8 : i32
    %c0_75 = arith.constant 0 : index
    %c0_76 = arith.constant 0 : index
    %c0_77 = arith.constant 0 : index
    %236 = vector.load %arg9[%c0_75, %c0_76, %c0_77] : memref<8x8x128xbf16, #tpu.memory_space<vmem>>, vector<8x8x128xbf16>
    %237 = vector.shape_cast %236 : vector<8x8x128xbf16> to vector<64x128xbf16>
    %c0_78 = arith.constant 0 : index
    %c0_79 = arith.constant 0 : index
    %238 = vector.load %arg5[%c0_78, %c0_79] : memref<128x128xbf16, #tpu.memory_space<vmem>>, vector<128x128xbf16>
    %cst_80 = arith.constant dense<0.000000e+00> : vector<64x128xf32>
    %239 = tpu.matmul %237, %238, %cst_80 {dimension_numbers = #tpu.dot_dimension_numbers<[1], [0], [0], [1], [0, 0, 1, 1], [], []>} : vector<64x128xbf16>, vector<128x128xbf16>, vector<64x128xf32> -> vector<64x128xf32>
    %c0_81 = arith.constant 0 : index
    %c0_82 = arith.constant 0 : index
    %240 = vector.load %arg6[%c0_81, %c0_82] : memref<1x128xf32, #tpu.memory_space<vmem>>, vector<1x128xf32>
    %241 = vector.broadcast %240 : vector<1x128xf32> to vector<64x128xf32>
    %242 = arith.addf %239, %241 : vector<64x128xf32>
    %243 = vector.shape_cast %242 : vector<64x128xf32> to vector<8x8x128xf32>
    %c0_83 = arith.constant 0 : index
    %c0_84 = arith.constant 0 : index
    %c0_85 = arith.constant 0 : index
    %244 = vector.load %arg7[%c0_83, %c0_84, %c0_85] : memref<8x8x128xf32, #tpu.memory_space<vmem>>, vector<8x8x128xf32>
    tpu.vector_store %arg7[%c0_83, %c0_84, %c0_85], %243 {strides = array<i32>} : memref<8x8x128xf32, #tpu.memory_space<vmem>>, vector<8x8x128xf32>,
    return
  }
  func.func @transform_0(%arg0: i32) -> (i32, i32, i32) {
    %c0_i32 = arith.constant 0 : i32
    %c0_i32_0 = arith.constant 0 : i32
    %c0_i32_1 = arith.constant 0 : i32
    return %c0_i32, %arg0, %c0_i32_0 : i32, i32, i32
  }
  func.func @transform_1(%arg0: i32) -> (i32, i32) {
    %c0_i32 = arith.constant 0 : i32
    %c0_i32_0 = arith.constant 0 : i32
    %c0_i32_1 = arith.constant 0 : i32
    return %c0_i32, %c0_i32_0 : i32, i32
  }
  func.func @transform_2(%arg0: i32) -> (i32, i32) {
    %c0_i32 = arith.constant 0 : i32
    %c0_i32_0 = arith.constant 0 : i32
    %c0_i32_1 = arith.constant 0 : i32
    return %c0_i32, %c0_i32_0 : i32, i32
  }
  func.func @transform_3(%arg0: i32) -> (i32, i32) {
    %c0_i32 = arith.constant 0 : i32
    %c0_i32_0 = arith.constant 0 : i32
    %c0_i32_1 = arith.constant 0 : i32
    return %c0_i32, %c0_i32_0 : i32, i32
  }
  func.func @transform_4(%arg0: i32) -> (i32, i32) {
    %c0_i32 = arith.constant 0 : i32
    %c0_i32_0 = arith.constant 0 : i32
    %c0_i32_1 = arith.constant 0 : i32
    return %c0_i32, %c0_i32_0 : i32, i32
  }
  func.func @transform_5(%arg0: i32) -> (i32, i32) {
    %c0_i32 = arith.constant 0 : i32
    %c0_i32_0 = arith.constant 0 : i32
    %c0_i32_1 = arith.constant 0 : i32
    return %c0_i32, %c0_i32_0 : i32, i32
  }
  func.func @transform_6(%arg0: i32) -> (i32, i32, i32) {
    %c0_i32 = arith.constant 0 : i32
    %c0_i32_0 = arith.constant 0 : i32
    %c0_i32_1 = arith.constant 0 : i32
    return %c0_i32, %arg0, %c0_i32_0 : i32, i32, i32
  }
}

</mosaic_0001>

<bundles_post_ra>
// kernel: joint_model_forward.1
= control target key start
LH: loop header
LB: loop body
LE: loop exit
PB: predicated region body
PF: predicated region fallthrough
CT: control target
= control target key end

     0   :  { %vm83_vm0 = vcmask 1043456   ;;  %v4416_v1 = vmov 0   ;;  %vm70_vm1 = vcmask 64512   ;;  %v40_v53 = vlaneseq  ;;  %s4409_s1 = inlined_call_operand.vmem [shape: bf16[8,512], index: 1, kind: input, shape index: {}]   ;;  %s4410_s0 = inlined_call_operand.vmem [shape: f32[8,8,8], index: 0, kind: input, shape index: {}]   ;;  %s4411_s2 = inlined_call_operand.vmem [shape: bf16[128,512], index: 2, kind: input, shape index: {}]   ;;  %s4412_s3 = inlined_call_operand.vmem [shape: f32[1,512], index: 3, kind: input, shape index: {}]   ;;  %s4413_s4 = inlined_call_operand.vmem [shape: bf16[128,128], index: 4, kind: input, shape index: {}]   ;;  %s4414_s5 = inlined_call_operand.vmem [shape: f32[1,128], index: 5, kind: input, shape index: {}]   ;;  %s4415_s6 = inlined_call_operand.vmem [shape: f32[8,8,128], index: 6, kind: output, shape index: {}]  }
   0x1   :  { %v37_v0 = vld [vmem:[%s4409_s1 + $0x8] sm:$0xff]  ;;  %201 = vmatprep.mubr.bf16.mxu1 %v4416_v1  ;;  %v24_v2 = vld [vmem:[%s4410_s0] sm:$0xff]  ;;  %128 = vmatprep.mubr.bf16.mxu0 %v4416_v1  ;;  %v26_v12 = vld [vmem:[%s4410_s0 + $0x10] sm:$0xff] }
   0x2   :  { %v25_v3 = vld [vmem:[%s4410_s0 + $0x8] sm:$0xff]  ;;  %v2935_v4 = vcombine.high %v37_v0, %v37_v0  ;;  %v2934_v5 = vcombine.low %v37_v0, %v37_v0  ;;  %v3575_v6 = vld [vmem:[%s4411_s2 + $0x4] ss:$16 sps:$4 sm:$0xff]   ;;  %v3582_v9 = vld [vmem:[%s4411_s2] ss:$16 sps:$4 sm:$0xff]   ;;  %v41_v54 = vshrl.u32 %v40_v53, 7 }
   0x3   :  { %v32_v8 = vpack.c.bf16 %v25_v3, %v24_v2  ;;  %v3588_v10 = vld [vmem:[%s4411_s2 + $0x24] ss:$16 sps:$4 sm:$0xff]   ;;  %v3594_v11 = vld [vmem:[%s4411_s2 + $0x20] ss:$16 sps:$4 sm:$0xff]   ;;  %v27_v13 = vld [vmem:[%s4410_s0 + $0x18] sm:$0xff] }
   0x4   :  { %2941 = vmatprep.subr.msk.bf16.mxu1 %vm83_vm0, %v2935_v4  ;;  %v91_v7 = vsel %vm83_vm0, %v2934_v5, 0  ;;  %v3608_v14 = vld [vmem:[%s4411_s2 + $0x44] ss:$16 sps:$4 sm:$0xff]   ;;  %v33_v15 = vpack.c.bf16 %v27_v13, %v26_v12  ;;  %v3614_v16 = vld [vmem:[%s4411_s2 + $0x40] ss:$16 sps:$4 sm:$0xff]   ;;  %v29_v24 = vld [vmem:[%s4410_s0 + $0x28] sm:$0xff] }
   0x5   :  { %170 = vmatpush1.bf16.msra.mxu1 %v91_v7  ;;  %v36_v17 = vld [vmem:[%s4409_s1] sm:$0xff]  ;;  %v30_v30 = vld [vmem:[%s4410_s0 + $0x30] sm:$0xff]  ;;  %v31_v31 = vld [vmem:[%s4410_s0 + $0x38] sm:$0xff]  ;;  %v50_v55 = vsub.s32 2, %v41_v54  ;;  %v54_v57 = vsub.s32 3, %v41_v54  ;;  %v42_v12 = vsub.s32 0, %v41_v54 }
   0x6   :  { %470 = vmatprep.subr.bf16.mxu1 %v3575_v6  ;;  %v3623_v18 = vld [vmem:[%s4411_s2 + $0x64] ss:$16 sps:$4 sm:$0xff]   ;;  %v2933_v19 = vcombine.high %v36_v17, %v36_v17  ;;  %v2932_v20 = vcombine.low %v36_v17, %v36_v17  ;;  %v3629_v21 = vld [vmem:[%s4411_s2 + $0x60] ss:$16 sps:$4 sm:$0xff]   ;;  %v35_v34 = vpack.c.bf16 %v31_v31, %v30_v30  ;;  %v3711_v37 = vld [vmem:[%s4411_s2 + $0xc] ss:$16 sps:$4 sm:$0xff]  }
   0x7   :  { %v28_v23 = vld [vmem:[%s4410_s0 + $0x20] sm:$0xff]  ;;  %v3720_v38 = vld [vmem:[%s4411_s2 + $0x8] ss:$16 sps:$4 sm:$0xff]   ;;  %v3729_v39 = vld [vmem:[%s4411_s2 + $0x2c] ss:$16 sps:$4 sm:$0xff]   ;;  %v46_v17 = vsub.s32 1, %v41_v54 }
   0x8   :  { %2942 = vmatmul.mubr.msk.bf16.vlgmr.msra.gmra.mrb[0].mxu1 %vm70_vm1, %v32_v8  ;;  %2936 = vmatprep.subr.msk.bf16.mxu0 %vm83_vm0, %v2933_v19  ;;  %v85_v22 = vsel %vm83_vm0, %v2932_v20, 0  ;;  %v3645_v25 = vld [vmem:[%s4411_s2 + $0x84] ss:$16 sps:$4 sm:$0xff]   ;;  %v34_v26 = vpack.c.bf16 %v29_v24, %v28_v23  ;;  %v3652_v27 = vld [vmem:[%s4411_s2 + $0x80] ss:$16 sps:$4 sm:$0xff]  }
   0x9   :  { %471 = vmatpush1.bf16.msra.mxu1 %v3582_v9  ;;  %211 = vmatprep.mubr.bf16.mxu1 %v4416_v1  ;;  %v3659_v28 = vld [vmem:[%s4411_s2 + $0xa4] ss:$16 sps:$4 sm:$0xff]   ;;  %v3668_v29 = vld [vmem:[%s4411_s2 + $0xa0] ss:$16 sps:$4 sm:$0xff]   ;;  %v3739_v40 = vld [vmem:[%s4411_s2 + $0x28] ss:$16 sps:$4 sm:$0xff]  }
   0xa   :  { %472 = vmatprep.subr.bf16.mxu1 %v3588_v10  ;;  %97 = vmatpush1.bf16.msra.mxu0 %v85_v22  ;;  %v3681_v32 = vld [vmem:[%s4411_s2 + $0xc4] ss:$16 sps:$4 sm:$0xff]   ;;  %v3688_v33 = vld [vmem:[%s4411_s2 + $0xc0] ss:$16 sps:$4 sm:$0xff]   ;;  %v3746_v41 = vld [vmem:[%s4411_s2 + $0x4c] ss:$16 sps:$4 sm:$0xff]  }
   0xb   :  { %779 = vmatprep.subr.bf16.mxu0 %v3575_v6  ;;  %v3694_v35 = vld [vmem:[%s4411_s2 + $0xe4] ss:$16 sps:$4 sm:$0xff]   ;;  %v3703_v36 = vld [vmem:[%s4411_s2 + $0xe0] ss:$16 sps:$4 sm:$0xff]   ;;  %v3754_v42 = vld [vmem:[%s4411_s2 + $0x48] ss:$16 sps:$4 sm:$0xff]  }
   0xc   :  { %v3761_v43 = vld [vmem:[%s4411_s2 + $0x6c] ss:$16 sps:$4 sm:$0xff]   ;;  %v3770_v44 = vld [vmem:[%s4411_s2 + $0x68] ss:$16 sps:$4 sm:$0xff]   ;;  %v38_v56 = vld [vmem:[%s4412_s3] sm:$0xf] }
   0xd   :  { %473 = vmatpush1.bf16.msra.mxu1 %v3594_v11  ;;  %2937 = vmatmul.mubr.msk.bf16.vlgmr.msra.gmra.mrb[0].mxu0 %vm70_vm1, %v32_v8  ;;  %v3776_v45 = vld [vmem:[%s4411_s2 + $0x8c] ss:$16 sps:$4 sm:$0xff]   ;;  %v3784_v46 = vld [vmem:[%s4411_s2 + $0x88] ss:$16 sps:$4 sm:$0xff]   ;;  %v3846_v58 = vrot.slane %v38_v56, %v50_v55  ;;  %v3852_v61 = vrot.slane %v38_v56, %v54_v57  ;;  %v43_v22 = vrot.slane %v38_v56, %v42_v12 }
   0xe   :  { %474 = vmatprep.subr.bf16.mxu1 %v3608_v14  ;;  %780 = vmatpush1.bf16.msra.mxu0 %v3582_v9  ;;  %v3790_v47 = vld [vmem:[%s4411_s2 + $0xac] ss:$16 sps:$4 sm:$0xff]   ;;  %v3796_v48 = vld [vmem:[%s4411_s2 + $0xa8] ss:$16 sps:$4 sm:$0xff]   ;;  %v47_v24 = vrot.slane %v38_v56, %v46_v17 }
   0xf   :  { %781 = vmatprep.subr.bf16.mxu0 %v3588_v10  ;;  %138 = vmatprep.mubr.bf16.mxu0 %v4416_v1  ;;  %v3802_v49 = vld [vmem:[%s4411_s2 + $0xcc] ss:$16 sps:$4 sm:$0xff]   ;;  %v3808_v50 = vld [vmem:[%s4411_s2 + $0xc8] ss:$16 sps:$4 sm:$0xff]  }
  0x10   :  { %2943 = vmatmul.mubr.msk.bf16.gmra.mrb[4].mxu1 %vm70_vm1, %v33_v15  ;;  %v3814_v51 = vld [vmem:[%s4411_s2 + $0xec] ss:$16 sps:$4 sm:$0xff]   ;;  %v3820_v52 = vld [vmem:[%s4411_s2 + $0xe8] ss:$16 sps:$4 sm:$0xff]  }
  0x11   :  { %475 = vmatpush1.bf16.msra.mxu1 %v3614_v16  ;;  %221 = vmatprep.mubr.bf16.mxu1 %v4416_v1 }
  0x12   :  { %476 = vmatprep.subr.bf16.mxu1 %v3623_v18  ;;  %782 = vmatpush1.bf16.msra.mxu0 %v3594_v11 }
  0x13   :  { %783 = vmatprep.subr.bf16.mxu0 %v3608_v14 }
  0x15   :  { %477 = vmatpush1.bf16.msra.mxu1 %v3629_v21  ;;  %2938 = vmatmul.mubr.msk.bf16.gmra.mrb[4].mxu0 %vm70_vm1, %v33_v15 }
  0x16   :  { %478 = vmatprep.subr.bf16.mxu1 %v3645_v25  ;;  %784 = vmatpush1.bf16.msra.mxu0 %v3614_v16 }
  0x17   :  { %785 = vmatprep.subr.bf16.mxu0 %v3623_v18  ;;  %148 = vmatprep.mubr.bf16.mxu0 %v4416_v1 }
  0x18   :  { %2944 = vmatmul.mubr.msk.bf16.gmra.mrb[8].mxu1 %vm70_vm1, %v34_v26 }
  0x19   :  { %479 = vmatpush1.bf16.msra.mxu1 %v3652_v27  ;;  %231 = vmatprep.mubr.bf16.mxu1 %v4416_v1 }
  0x1a   :  { %480 = vmatprep.subr.bf16.mxu1 %v3659_v28  ;;  %786 = vmatpush1.bf16.msra.mxu0 %v3629_v21 }
  0x1b   :  { %787 = vmatprep.subr.bf16.mxu0 %v3645_v25 }
  0x1d   :  { %481 = vmatpush1.bf16.msra.mxu1 %v3668_v29  ;;  %2939 = vmatmul.mubr.msk.bf16.gmra.mrb[8].mxu0 %vm70_vm1, %v34_v26 }
  0x1e   :  { %482 = vmatprep.subr.bf16.mxu1 %v3681_v32  ;;  %788 = vmatpush1.bf16.msra.mxu0 %v3652_v27 }
  0x1f   :  { %789 = vmatprep.subr.bf16.mxu0 %v3659_v28  ;;  %158 = vmatprep.mubr.bf16.mxu0 %v4416_v1 }
  0x20   :  { %2945 = vmatmul.mubr.msk.bf16.gmra.mrb[12].mxu1 %vm70_vm1, %v35_v34 }
  0x21   :  { %483 = vmatpush1.bf16.msra.mxu1 %v3688_v33  ;;  %502 = vmatprep.mubr.bf16.mxu1 %v4416_v1 }
  0x22   :  { %484 = vmatprep.subr.bf16.mxu1 %v3694_v35  ;;  %790 = vmatpush1.bf16.msra.mxu0 %v3668_v29 }
  0x23   :  { %791 = vmatprep.subr.bf16.mxu0 %v3681_v32 }
  0x25   :  { %485 = vmatpush1.bf16.msra.mxu1 %v3703_v36  ;;  %2940 = vmatmul.mubr.msk.bf16.gmra.mrb[12].mxu0 %vm70_vm1, %v35_v34 }
  0x26   :  { %511 = vmatprep.subr.bf16.mxu1 %v3711_v37  ;;  %792 = vmatpush1.bf16.msra.mxu0 %v3688_v33 }
  0x27   :  { %793 = vmatprep.subr.bf16.mxu0 %v3694_v35  ;;  %811 = vmatprep.mubr.bf16.mxu0 %v4416_v1 }
  0x28   :  { %503 = vmatmul.mubr.bf16.vlgmr.msra.gmra.mrb[16].mxu1 %v4416_v1 }
  0x29   :  { %512 = vmatpush1.bf16.msra.mxu1 %v3720_v38  ;;  %543 = vmatprep.mubr.bf16.mxu1 %v4416_v1 }
  0x2a   :  { %513 = vmatprep.subr.bf16.mxu1 %v3729_v39  ;;  %794 = vmatpush1.bf16.msra.mxu0 %v3703_v36 }
  0x2b   :  { %1089 = vmatprep.subr.bf16.mxu0 %v3575_v6 }
  0x2d   :  { %514 = vmatpush1.bf16.msra.mxu1 %v3739_v40 }
  0x2e   :  { %515 = vmatprep.subr.bf16.mxu1 %v3746_v41 }
  0x31   :  { %516 = vmatpush1.bf16.msra.mxu1 %v3754_v42 }
  0x32   :  { %517 = vmatprep.subr.bf16.mxu1 %v3761_v43 }
  0x35   :  { %518 = vmatpush1.bf16.msra.mxu1 %v3770_v44 }
  0x36   :  { %519 = vmatprep.subr.bf16.mxu1 %v3776_v45 }
  0x39   :  { %520 = vmatpush1.bf16.msra.mxu1 %v3784_v46 }
  0x3a   :  { %521 = vmatprep.subr.bf16.mxu1 %v3790_v47 }
  0x3d   :  { %522 = vmatpush1.bf16.msra.mxu1 %v3796_v48 }
  0x3e   :  { %523 = vmatprep.subr.bf16.mxu1 %v3802_v49 }
  0x41   :  { %524 = vmatpush1.bf16.msra.mxu1 %v3808_v50 }
  0x42   :  { %525 = vmatprep.subr.bf16.mxu1 %v3814_v51 }
  0x45   :  { %526 = vmatpush1.bf16.msra.mxu1 %v3820_v52 }
  0x46   :  { %820 = vmatprep.subr.bf16.mxu1 %v3711_v37 }
  0x48   :  { %544 = vmatmul.mubr.bf16.vlgmr.msra.gmra.mrb[20].mxu1 %v4416_v1 }
  0x49   :  { %821 = vmatpush1.bf16.msra.mxu1 %v3720_v38  ;;  %852 = vmatprep.mubr.bf16.mxu1 %v4416_v1 }
  0x4a   :  { %822 = vmatprep.subr.bf16.mxu1 %v3729_v39 }
  0x4d   :  { %823 = vmatpush1.bf16.msra.mxu1 %v3739_v40 }
  0x4e   :  { %824 = vmatprep.subr.bf16.mxu1 %v3746_v41 }
  0x51   :  { %825 = vmatpush1.bf16.msra.mxu1 %v3754_v42 }
  0x52   :  { %826 = vmatprep.subr.bf16.mxu1 %v3761_v43 }
  0x55   :  { %827 = vmatpush1.bf16.msra.mxu1 %v3770_v44 }
  0x56   :  { %828 = vmatprep.subr.bf16.mxu1 %v3776_v45 }
  0x59   :  { %829 = vmatpush1.bf16.msra.mxu1 %v3784_v46 }
  0x5a   :  { %830 = vmatprep.subr.bf16.mxu1 %v3790_v47 }
  0x5d   :  { %831 = vmatpush1.bf16.msra.mxu1 %v3796_v48 }
  0x5e   :  { %832 = vmatprep.subr.bf16.mxu1 %v3802_v49 }
  0x61   :  { %833 = vmatpush1.bf16.msra.mxu1 %v3808_v50 }
  0x62   :  { %834 = vmatprep.subr.bf16.mxu1 %v3814_v51 }
  0x65   :  { %835 = vmatpush1.bf16.msra.mxu1 %v3820_v52 }
  0x66   :  { %1130 = vmatprep.subr.bf16.mxu1 %v3711_v37 }
  0xdb   :  { %v3848_v59 = vpop.f32.mrb[0].mxu1 }
  0xdc   :  { %v3850_v60 = vpop.f32.mrb[1].mxu1 }
  0xdd   :  { %v207_v62 = vpop.f32.mrb[2].mxu1 }
  0xde   :  { %v3855_v63 = vadd.f32 %v207_v62, %v3846_v58  ;;  %v209_v0 = vpop.f32.mrb[3].mxu1 }
  0xdf   :  { %v3858_v2 = vadd.f32 %v209_v0, %v3852_v61 }
  0xe0   :  { %v130_v20 = vpop.f32.mrb[0].mxu0 }
  0xe1   :  { %v132_v23 = vpop.f32.mrb[1].mxu0 }
  0xe2   :  { %v134_v26 = vpop.f32.mrb[2].mxu0 }
  0xe3   :  { %v213_v3 = vpop.f32.mrb[4].mxu1  ;;  %v3872_v31 = vadd.f32 %v134_v26, %v43_v22  ;;  %v136_v34 = vpop.f32.mrb[3].mxu0 }
  0xe4   :  { %v3861_v4 = vadd.f32 %v213_v3, %v3846_v58  ;;  %v215_v5 = vpop.f32.mrb[5].mxu1  ;;  %v3877_v57 = vadd.f32 %v136_v34, %v47_v24 }
  0xe5   :  { %v3864_v7 = vadd.f32 %v215_v5, %v3852_v61  ;;  %v217_v8 = vpop.f32.mrb[6].mxu1 }
  0xe6   :  { %v3867_v13 = vadd.f32 %v217_v8, %v3846_v58  ;;  %v219_v15 = vpop.f32.mrb[7].mxu1 }
  0xe7   :  { %4418 = vst [vmem:[#allocation4_spill] sm:$0xff] %v3864_v7  ;;  %v3870_v19 = vadd.f32 %v219_v15, %v3852_v61 }
  0xe8   :  { %4419 = vst [vmem:[#allocation5_spill] sm:$0xff] %v3867_v13  ;;  %v140_v5 = vpop.f32.mrb[4].mxu0 }
  0xe9   :  { %4420 = vst [vmem:[#allocation6_spill] sm:$0xff] %v3870_v19  ;;  %v3888_v8 = vadd.f32 %v140_v5, %v43_v22  ;;  %v142_v12 = vpop.f32.mrb[5].mxu0 }
  0xea   :  { %v3890_v15 = vadd.f32 %v142_v12, %v47_v24  ;;  %v144_v17 = vpop.f32.mrb[6].mxu0 }
  0xeb   :  { %v223_v30 = vpop.f32.mrb[8].mxu1  ;;  %v146_v34 = vpop.f32.mrb[7].mxu0 }
  0xec   :  { %v3875_v53 = vadd.f32 %v223_v30, %v3846_v58  ;;  %v225_v55 = vpop.f32.mrb[9].mxu1  ;;  %v3892_v30 = vadd.f32 %v144_v17, %v43_v22  ;;  %v3897_v1 = vadd.f32 %v146_v34, %v47_v24  ;;  %v131_v17 = vadd.f32 %v130_v20, %v43_v22 }
  0xed   :  { %v3880_v54 = vadd.f32 %v225_v55, %v3852_v61  ;;  %v227_v62 = vpop.f32.mrb[10].mxu1 }
  0xee   :  { %4421 = vst [vmem:[#allocation7_spill] sm:$0xff] %v3875_v53  ;;  %v3883_v0 = vadd.f32 %v227_v62, %v3846_v58  ;;  %v229_v3 = vpop.f32.mrb[11].mxu1  ;;  %4425 = vst [vmem:[#allocation11_spill] sm:$0xff] %v3892_v30  ;;  %v133_v53 = vadd.f32 %v132_v23, %v47_v24 }
  0xef   :  { %4422 = vst [vmem:[#allocation8_spill] sm:$0xff] %v3880_v54  ;;  %v3886_v56 = vadd.f32 %v229_v3, %v3852_v61  ;;  %4427 = vst [vmem:[#allocation13_spill] sm:$0xff] %v3897_v1 }
  0xf0   :  { %4423 = vst [vmem:[#allocation9_spill] sm:$0xff] %v3883_v0  ;;  %v150_v54 = vpop.f32.mrb[8].mxu0 }
  0xf1   :  { %4424 = vst [vmem:[#allocation10_spill] sm:$0xff] %v3886_v56  ;;  %v3908_v19 = vadd.f32 %v150_v54, %v43_v22 }
  0xf3   :  { %v233_v26 = vpop.f32.mrb[12].mxu1  ;;  %4431 = vst [vmem:[#allocation17_spill] sm:$0xff] %v3908_v19 }
  0xf4   :  { %v3895_v55 = vadd.f32 %v233_v26, %v3846_v58  ;;  %v235_v62 = vpop.f32.mrb[13].mxu1  ;;  %v152_v26 = vpop.f32.mrb[9].mxu0 }
  0xf5   :  { %v3900_v3 = vadd.f32 %v235_v62, %v3852_v61  ;;  %v237_v56 = vpop.f32.mrb[14].mxu1  ;;  %v154_v34 = vpop.f32.mrb[10].mxu0 }
  0xf6   :  { %4426 = vst [vmem:[#allocation12_spill] sm:$0xff] %v3895_v55  ;;  %v3903_v5 = vadd.f32 %v237_v56, %v3846_v58  ;;  %v239_v12 = vpop.f32.mrb[15].mxu1  ;;  %v3910_v55 = vadd.f32 %v152_v26, %v47_v24  ;;  %v3912_v62 = vadd.f32 %v154_v34, %v43_v22 }
  0xf7   :  { %4428 = vst [vmem:[#allocation14_spill] sm:$0xff] %v3900_v3  ;;  %v3906_v0 = vadd.f32 %v239_v12, %v3852_v61  ;;  %v156_v3 = vpop.f32.mrb[11].mxu0 }
  0xf8   :  { %4429 = vst [vmem:[#allocation15_spill] sm:$0xff] %v3903_v5  ;;  %4432 = vst [vmem:[#allocation18_spill] sm:$0xff] %v3910_v55  ;;  %v3914_v5 = vadd.f32 %v156_v3, %v47_v24  ;;  %v160_v20 = vpop.f32.mrb[12].mxu0 }
  0xf9   :  { %4430 = vst [vmem:[#allocation16_spill] sm:$0xff] %v3906_v0  ;;  %4433 = vst [vmem:[#allocation19_spill] sm:$0xff] %v3912_v62  ;;  %v3916_v7 = vadd.f32 %v160_v20, %v43_v22  ;;  %v162_v23 = vpop.f32.mrb[13].mxu0 }
  0xfa   :  { %v3918_v54 = vadd.f32 %v162_v23, %v47_v24  ;;  %v164_v26 = vpop.f32.mrb[14].mxu0 }
  0xfb   :  { %v504_v1 = vpop.f32.mrb[16].mxu1  ;;  %v3920_v55 = vadd.f32 %v164_v26, %v43_v22  ;;  %v166_v19 = vpop.f32.mrb[15].mxu0 }
  0xfc   :  { %v552_v13 = vadd.f32 %v504_v1, %v131_v17  ;;  %v506_v56 = vpop.f32.mrb[17].mxu1  ;;  %v3922_v34 = vadd.f32 %v166_v19, %v47_v24 }
  0xfd   :  { %v553_v30 = vadd.f32 %v506_v56, %v133_v53  ;;  %v508_v12 = vpop.f32.mrb[18].mxu1 }
  0xfe   :  { %v509_v0 = vpop.f32.mrb[19].mxu1  ;;  %4434 = vst [vmem:[#allocation20_spill] sm:$0xff] %v3922_v34  ;;  %v2978_v1 = vmul.f32 -1.442695, %v552_v13  ;;  %v206_v12 = vadd.f32 %v3850_v60, %v3852_v61 }
  0xff   :  { %v2979_v62 = vmul.f32 -1.442695, %v553_v30  ;;  %v204_v0 = vadd.f32 %v3848_v59, %v3846_v58 }
 0x101   :  { %3397 = vpow2.f32 %v2979_v62 }
 0x102   :  { %3399 = vpow2.f32 %v2978_v1 }
 0x10b   :  { %v3398_v3 = vpop.eup %3397 }
 0x10c   :  { %v3400_v53 = vpop.eup %3399  ;;  %v566_v17 = vadd.f32 1.0, %v3398_v3 }
 0x10d   :  { %v565_v56 = vadd.f32 1.0, %v3400_v53 }
 0x10e   :  { %3401 = vrcp.f32 %v566_v17 }
 0x10f   :  { %3403 = vrcp.f32 %v565_v56  ;;  %v4435_v56 = vmov 0  }
 0x118   :  { %v3402_v62 = vpop.eup %3401 }
 0x119   :  { %v3404_v26 = vpop.eup %3403  ;;  %v575_v58 = vmul.f32 0.0, %v3402_v62 }
 0x11b   :  { %v545_v20 = vpop.f32.mrb[20].mxu1 }
 0x11c   :  { %v554_v22 = vadd.f32 %v545_v20, %v204_v0  ;;  %v547_v23 = vpop.f32.mrb[21].mxu1 }
 0x11d   :  { %v555_v19 = vadd.f32 %v547_v23, %v206_v12  ;;  %v549_v24 = vpop.f32.mrb[22].mxu1 }
 0x11e   :  { %v2980_v13 = vmul.f32 -1.442695, %v554_v22  ;;  %v550_v30 = vpop.f32.mrb[23].mxu1 }
 0x11f   :  { %3405 = vtanh.f32 %v555_v19 }
 0x120   :  { %3407 = vpow2.f32 %v2980_v13 }
 0x129   :  { %v3406_v1 = vpop.eup %3405 }
 0x12a   :  { %v3408_v3 = vpop.eup %3407  ;;  %v576_v59 = vmul.f32 %v3406_v1, %v3404_v26 }
 0x12b   :  { %v567_v53 = vadd.f32 1.0, %v3408_v3 }
 0x12c   :  { %v3928_v34 = vadd.f32 %v576_v59, %v575_v58 }
 0x12d   :  { %3409 = vrcp.f32 %v567_v53 }
 0x12e   :  { %3411 = vtanh.f32 %v3928_v34 }
 0x137   :  { %v3410_v60 = vpop.eup %3409 }
 0x138   :  { %v3412_v61 = vpop.eup %3411 }
 0x139   :  { %v579_v17 = vmul.f32 %v3412_v61, %v3410_v60 }
 0x13b   :  { %v580_v0 = vpack.c.bf16 %v579_v17, %v579_v17 }
 0x13d   :  { %581 = vst [vmem:[#allocation3] sm:$0xf] %v580_v0  ;;  %812 = vmatmul.mubr.bf16.vlgmr.msra.gmra.mrb[16].mxu0 %v580_v0  ;;  %853 = vmatmul.mubr.bf16.vlgmr.msra.gmra.mrb[24].mxu1 %v580_v0 }
 0x13e   :  { %1090 = vmatpush1.bf16.msra.mxu0 %v3582_v9  ;;  %1131 = vmatpush1.bf16.msra.mxu1 %v3720_v38 }
 0x13f   :  { %1091 = vmatprep.subr.bf16.mxu0 %v3588_v10  ;;  %1132 = vmatprep.subr.bf16.mxu1 %v3729_v39 }
 0x140   :  { %1121 = vmatprep.mubr.bf16.mxu0 %v4435_v56  ;;  %1162 = vmatprep.mubr.bf16.mxu1 %v4435_v56 }
 0x142   :  { %1092 = vmatpush1.bf16.msra.mxu0 %v3594_v11  ;;  %1133 = vmatpush1.bf16.msra.mxu1 %v3739_v40 }
 0x143   :  { %1093 = vmatprep.subr.bf16.mxu0 %v3608_v14  ;;  %1134 = vmatprep.subr.bf16.mxu1 %v3746_v41 }
 0x146   :  { %1094 = vmatpush1.bf16.msra.mxu0 %v3614_v16  ;;  %1135 = vmatpush1.bf16.msra.mxu1 %v3754_v42 }
 0x147   :  { %1095 = vmatprep.subr.bf16.mxu0 %v3623_v18  ;;  %1136 = vmatprep.subr.bf16.mxu1 %v3761_v43 }
 0x14a   :  { %1096 = vmatpush1.bf16.msra.mxu0 %v3629_v21  ;;  %1137 = vmatpush1.bf16.msra.mxu1 %v3770_v44 }
 0x14b   :  { %1097 = vmatprep.subr.bf16.mxu0 %v3645_v25  ;;  %1138 = vmatprep.subr.bf16.mxu1 %v3776_v45 }
 0x14e   :  { %1098 = vmatpush1.bf16.msra.mxu0 %v3652_v27  ;;  %1139 = vmatpush1.bf16.msra.mxu1 %v3784_v46 }
 0x14f   :  { %1099 = vmatprep.subr.bf16.mxu0 %v3659_v28  ;;  %1140 = vmatprep.subr.bf16.mxu1 %v3790_v47 }
 0x152   :  { %1100 = vmatpush1.bf16.msra.mxu0 %v3668_v29  ;;  %1141 = vmatpush1.bf16.msra.mxu1 %v3796_v48 }
 0x153   :  { %1101 = vmatprep.subr.bf16.mxu0 %v3681_v32  ;;  %1142 = vmatprep.subr.bf16.mxu1 %v3802_v49 }
 0x156   :  { %1102 = vmatpush1.bf16.msra.mxu0 %v3688_v33  ;;  %1143 = vmatpush1.bf16.msra.mxu1 %v3808_v50 }
 0x157   :  { %1103 = vmatprep.subr.bf16.mxu0 %v3694_v35  ;;  %1144 = vmatprep.subr.bf16.mxu1 %v3814_v51 }
 0x15a   :  { %1104 = vmatpush1.bf16.msra.mxu0 %v3703_v36  ;;  %1145 = vmatpush1.bf16.msra.mxu1 %v3820_v52 }
 0x15b   :  { %1399 = vmatprep.subr.bf16.mxu0 %v3575_v6  ;;  %1440 = vmatprep.subr.bf16.mxu1 %v3711_v37 }
 0x210   :  { %v813_v28 = vpop.f32.mrb[16].mxu0  ;;  %v854_v29 = vpop.f32.mrb[24].mxu1 }
 0x211   :  { %v861_v32 = vadd.f32 %v813_v28, %v3872_v31  ;;  %v863_v33 = vadd.f32 %v854_v29, %v3855_v63  ;;  %v815_v12 = vpop.f32.mrb[17].mxu0  ;;  %v856_v20 = vpop.f32.mrb[25].mxu1 }
 0x212   :  { %v862_v35 = vadd.f32 %v815_v12, %v3877_v57  ;;  %v864_v22 = vadd.f32 %v856_v20, %v3858_v2  ;;  %v817_v23 = vpop.f32.mrb[18].mxu0  ;;  %v858_v36 = vpop.f32.mrb[26].mxu1 }
 0x213   :  { %v3013_v19 = vmul.f32 -1.442695, %v861_v32  ;;  %v818_v24 = vpop.f32.mrb[19].mxu0  ;;  %v859_v13 = vpop.f32.mrb[27].mxu1  ;;  %v3015_v37 = vmul.f32 -1.442695, %v863_v33 }
 0x214   :  { %v3014_v6 = vmul.f32 -1.442695, %v862_v35  ;;  %v4053_v24 = vld [vmem:[%s4411_s2 + $0xc] ss:$16 sps:$4 sm:$0xff]   ;;  %v4058_v13 = vld [vmem:[%s4411_s2] ss:$16 sps:$4 sm:$0xff]  }
 0x215   :  { %3413 = vpow2.f32 %v3013_v19  ;;  %v4048_v19 = vld [vmem:[%s4411_s2 + $0x4] ss:$16 sps:$4 sm:$0xff]  }
 0x216   :  { %3415 = vpow2.f32 %v3014_v6  ;;  %v4063_v6 = vld [vmem:[%s4411_s2 + $0x8] ss:$16 sps:$4 sm:$0xff]  }
 0x217   :  { %3417 = vtanh.f32 %v864_v22 }
 0x218   :  { %3419 = vpow2.f32 %v3015_v37  ;;  %v4072_v37 = vld [vmem:[%s4411_s2 + $0x24] ss:$16 sps:$4 sm:$0xff]  }
 0x21f   :  { %v3414_v30 = vpop.eup %3413 }
 0x220   :  { %v874_v62 = vadd.f32 1.0, %v3414_v30  ;;  %v3416_v31 = vpop.eup %3415  ;;  %v4077_v30 = vld [vmem:[%s4411_s2 + $0x2c] ss:$16 sps:$4 sm:$0xff]  }
 0x221   :  { %v875_v63 = vadd.f32 1.0, %v3416_v31  ;;  %v3418_v57 = vpop.eup %3417  ;;  %v4087_v31 = vld [vmem:[%s4411_s2 + $0x28] ss:$16 sps:$4 sm:$0xff]  }
 0x222   :  { %3421 = vrcp.f32 %v874_v62  ;;  %v3420_v26 = vpop.eup %3419  ;;  %v4082_v62 = vld [vmem:[%s4411_s2 + $0x20] ss:$16 sps:$4 sm:$0xff]  }
 0x223   :  { %3423 = vrcp.f32 %v875_v63  ;;  %v876_v58 = vadd.f32 1.0, %v3420_v26  ;;  %v4096_v63 = vld [vmem:[%s4411_s2 + $0x44] ss:$16 sps:$4 sm:$0xff]   ;;  %v4106_v26 = vld [vmem:[%s4411_s2 + $0x40] ss:$16 sps:$4 sm:$0xff]  }
 0x225   :  { %3425 = vrcp.f32 %v876_v58  ;;  %v4130_v58 = vld [vmem:[%s4411_s2 + $0x60] ss:$16 sps:$4 sm:$0xff]  }
 0x22c   :  { %v3422_v2 = vpop.eup %3421 }
 0x22d   :  { %v885_v1 = vmul.f32 %v3422_v2, %v3418_v57  ;;  %v3424_v3 = vpop.eup %3423  ;;  %v4101_v57 = vld [vmem:[%s4411_s2 + $0x4c] ss:$16 sps:$4 sm:$0xff]   ;;  %v4111_v2 = vld [vmem:[%s4411_s2 + $0x48] ss:$16 sps:$4 sm:$0xff]  }
 0x22e   :  { %v884_v59 = vmul.f32 %v3424_v3, %v3928_v34  ;;  %v4125_v3 = vld [vmem:[%s4411_s2 + $0x6c] ss:$16 sps:$4 sm:$0xff]  }
 0x22f   :  { %v3426_v60 = vpop.eup %3425 }
 0x230   :  { %v3970_v53 = vadd.f32 %v885_v1, %v884_v59  ;;  %v4120_v1 = vld [vmem:[%s4411_s2 + $0x64] ss:$16 sps:$4 sm:$0xff]   ;;  %v4135_v59 = vld [vmem:[%s4411_s2 + $0x68] ss:$16 sps:$4 sm:$0xff]  }
 0x232   :  { %3427 = vtanh.f32 %v3970_v53 }
 0x23c   :  { %v3428_v61 = vpop.eup %3427 }
 0x23d   :  { %v888_v17 = vmul.f32 %v3428_v61, %v3426_v60  ;;  %v4149_v60 = vld [vmem:[%s4411_s2 + $0x8c] ss:$16 sps:$4 sm:$0xff]   ;;  %v4154_v61 = vld [vmem:[%s4411_s2 + $0x80] ss:$16 sps:$4 sm:$0xff]  }
 0x23f   :  { %v889_v0 = vpack.c.bf16 %v888_v17, %v888_v17  ;;  %v4159_v17 = vld [vmem:[%s4411_s2 + $0x88] ss:$16 sps:$4 sm:$0xff]  }
 0x241   :  { %891 = vst [vmem:[#allocation3 + $0x4] sm:$0xf] %v889_v0  ;;  %1122 = vmatmul.mubr.bf16.vlgmr.msra.gmra.mrb[20].mxu0 %v889_v0  ;;  %1163 = vmatmul.mubr.bf16.vlgmr.msra.gmra.mrb[28].mxu1 %v889_v0  ;;  %v4168_v0 = vld [vmem:[%s4411_s2 + $0xa8] ss:$16 sps:$4 sm:$0xff]  }
 0x242   :  { %1400 = vmatpush1.bf16.msra.mxu0 %v3582_v9  ;;  %1441 = vmatpush1.bf16.msra.mxu1 %v3720_v38  ;;  %v4002_v9 = vld [vmem:[%s4411_s2 + $0xa0] ss:$16 sps:$4 sm:$0xff]  }
 0x243   :  { %1401 = vmatprep.subr.bf16.mxu0 %v3588_v10  ;;  %1442 = vmatprep.subr.bf16.mxu1 %v3729_v39  ;;  %v4007_v10 = vld [vmem:[%s4411_s2 + $0xa4] ss:$16 sps:$4 sm:$0xff]  }
 0x244   :  { %1431 = vmatprep.mubr.bf16.mxu0 %v4435_v56  ;;  %1472 = vmatprep.mubr.bf16.mxu1 %v4435_v56 }
 0x246   :  { %1402 = vmatpush1.bf16.msra.mxu0 %v3594_v11  ;;  %1443 = vmatpush1.bf16.msra.mxu1 %v3739_v40  ;;  %v4012_v11 = vld [vmem:[%s4411_s2 + $0xc4] ss:$16 sps:$4 sm:$0xff]  }
 0x247   :  { %1403 = vmatprep.subr.bf16.mxu0 %v3608_v14  ;;  %1444 = vmatprep.subr.bf16.mxu1 %v3746_v41  ;;  %v4019_v14 = vld [vmem:[%s4411_s2 + $0xc0] ss:$16 sps:$4 sm:$0xff]  }
 0x24a   :  { %1404 = vmatpush1.bf16.msra.mxu0 %v3614_v16  ;;  %1445 = vmatpush1.bf16.msra.mxu1 %v3754_v42  ;;  %v4025_v16 = vld [vmem:[%s4411_s2 + $0xe4] ss:$16 sps:$4 sm:$0xff]  }
 0x24b   :  { %1405 = vmatprep.subr.bf16.mxu0 %v3623_v18  ;;  %1446 = vmatprep.subr.bf16.mxu1 %v3761_v43  ;;  %v4031_v18 = vld [vmem:[%s4411_s2 + $0xe0] ss:$16 sps:$4 sm:$0xff]  }
 0x24c   :  { %v4436_v42 = vld [vmem:[#allocation4_spill] sm:$0xff] }
 0x24e   :  { %1406 = vmatpush1.bf16.msra.mxu0 %v3629_v21  ;;  %1447 = vmatpush1.bf16.msra.mxu1 %v3770_v44 }
 0x24f   :  { %1407 = vmatprep.subr.bf16.mxu0 %v3645_v25  ;;  %1448 = vmatprep.subr.bf16.mxu1 %v3776_v45 }
 0x252   :  { %1408 = vmatpush1.bf16.msra.mxu0 %v3652_v27  ;;  %1449 = vmatpush1.bf16.msra.mxu1 %v3784_v46 }
 0x253   :  { %1450 = vmatprep.subr.bf16.mxu1 %v3790_v47  ;;  %1409 = vmatprep.subr.bf16.mxu0 %v4007_v10 }
 0x256   :  { %1451 = vmatpush1.bf16.msra.mxu1 %v3796_v48  ;;  %1410 = vmatpush1.bf16.msra.mxu0 %v4002_v9 }
 0x257   :  { %1452 = vmatprep.subr.bf16.mxu1 %v3802_v49  ;;  %1411 = vmatprep.subr.bf16.mxu0 %v4012_v11 }
 0x25a   :  { %1453 = vmatpush1.bf16.msra.mxu1 %v3808_v50  ;;  %1412 = vmatpush1.bf16.msra.mxu0 %v4019_v14 }
 0x25b   :  { %1454 = vmatprep.subr.bf16.mxu1 %v3814_v51  ;;  %1413 = vmatprep.subr.bf16.mxu0 %v4025_v16 }
 0x25e   :  { %1455 = vmatpush1.bf16.msra.mxu1 %v3820_v52  ;;  %1414 = vmatpush1.bf16.msra.mxu0 %v4031_v18 }
 0x25f   :  { %1709 = vmatprep.subr.bf16.mxu0 %v4048_v19  ;;  %1750 = vmatprep.subr.bf16.mxu1 %v4053_v24 }
 0x314   :  { %v1123_v21 = vpop.f32.mrb[20].mxu0  ;;  %v1164_v25 = vpop.f32.mrb[28].mxu1 }
 0x315   :  { %v1171_v27 = vadd.f32 %v1123_v21, %v3888_v8  ;;  %v1173_v38 = vadd.f32 %v1164_v25, %v3861_v4  ;;  %v1125_v39 = vpop.f32.mrb[21].mxu0  ;;  %v1166_v40 = vpop.f32.mrb[29].mxu1  ;;  %v4173_v21 = vld [vmem:[%s4411_s2 + $0xac] ss:$16 sps:$4 sm:$0xff]  }
 0x316   :  { %v1172_v41 = vadd.f32 %v1125_v39, %v3890_v15  ;;  %v1174_v43 = vadd.f32 %v1166_v40, %v4436_v42  ;;  %v1127_v44 = vpop.f32.mrb[22].mxu0  ;;  %v1168_v45 = vpop.f32.mrb[30].mxu1  ;;  %v4179_v25 = vld [vmem:[%s4411_s2 + $0xcc] ss:$16 sps:$4 sm:$0xff]   ;;  %v4201_v39 = vld [vmem:[%s4411_s2 + $0xe8] ss:$16 sps:$4 sm:$0xff]  }
 0x317   :  { %v3048_v46 = vmul.f32 -1.442695, %v1171_v27  ;;  %v1128_v47 = vpop.f32.mrb[23].mxu0  ;;  %v1169_v48 = vpop.f32.mrb[31].mxu1  ;;  %v3050_v50 = vmul.f32 -1.442695, %v1173_v38 }
 0x318   :  { %v3049_v49 = vmul.f32 -1.442695, %v1172_v41  ;;  %v4187_v27 = vld [vmem:[%s4411_s2 + $0xc8] ss:$16 sps:$4 sm:$0xff]   ;;  %v4194_v38 = vld [vmem:[%s4411_s2 + $0xec] ss:$16 sps:$4 sm:$0xff]  }
 0x319   :  { %3429 = vpow2.f32 %v3048_v46  ;;  %v4437_v42 = vld [vmem:[#allocation11_spill] sm:$0xff]  ;;  %v4438_v44 = vld [vmem:[#allocation5_spill] sm:$0xff] }
 0x31a   :  { %3431 = vpow2.f32 %v3049_v49  ;;  %v4439_v48 = vld [vmem:[#allocation13_spill] sm:$0xff] }
 0x31b   :  { %3433 = vtanh.f32 %v1174_v43 }
 0x31c   :  { %3435 = vpow2.f32 %v3050_v50  ;;  %v4440_v50 = vld [vmem:[#allocation6_spill] sm:$0xff] }
 0x323   :  { %v3430_v51 = vpop.eup %3429 }
 0x324   :  { %v1184_v52 = vadd.f32 1.0, %v3430_v51  ;;  %v3432_v8 = vpop.eup %3431 }
 0x325   :  { %v1185_v4 = vadd.f32 1.0, %v3432_v8  ;;  %v3434_v15 = vpop.eup %3433 }
 0x326   :  { %3437 = vrcp.f32 %v1184_v52  ;;  %v3436_v34 = vpop.eup %3435 }
 0x327   :  { %3439 = vrcp.f32 %v1185_v4  ;;  %v1186_v33 = vadd.f32 1.0, %v3436_v34 }
 0x329   :  { %3441 = vrcp.f32 %v1186_v33 }
 0x330   :  { %v3438_v28 = vpop.eup %3437 }
 0x331   :  { %v1195_v29 = vmul.f32 %v3438_v28, %v3434_v15  ;;  %v3440_v32 = vpop.eup %3439 }
 0x332   :  { %v1194_v12 = vmul.f32 %v3440_v32, %v3970_v53  ;;  %v4144_v53 = vld [vmem:[%s4411_s2 + $0x84] ss:$16 sps:$4 sm:$0xff]  }
 0x333   :  { %v3442_v35 = vpop.eup %3441 }
 0x334   :  { %v4040_v20 = vadd.f32 %v1195_v29, %v1194_v12 }
 0x336   :  { %3443 = vtanh.f32 %v4040_v20 }
 0x340   :  { %v3444_v22 = vpop.eup %3443 }
 0x341   :  { %v1198_v23 = vmul.f32 %v3444_v22, %v3442_v35 }
 0x343   :  { %v1199_v36 = vpack.c.bf16 %v1198_v23, %v1198_v23 }
 0x345   :  { %1201 = vst [vmem:[#allocation3 + $0x8] sm:$0xf] %v1199_v36  ;;  %1432 = vmatmul.mubr.bf16.vlgmr.msra.gmra.mrb[24].mxu0 %v1199_v36  ;;  %1473 = vmatmul.mubr.bf16.vlgmr.msra.gmra.mrb[32].mxu1 %v1199_v36 }
 0x346   :  { %1741 = vmatprep.mubr.bf16.mxu0 %v4435_v56  ;;  %1782 = vmatprep.mubr.bf16.mxu1 %v4435_v56 }
 0x347   :  { %1710 = vmatpush1.bf16.msra.mxu0 %v4058_v13  ;;  %1751 = vmatpush1.bf16.msra.mxu1 %v4063_v6 }
 0x348   :  { %1711 = vmatprep.subr.bf16.mxu0 %v4072_v37  ;;  %1752 = vmatprep.subr.bf16.mxu1 %v4077_v30 }
 0x34b   :  { %1712 = vmatpush1.bf16.msra.mxu0 %v4082_v62  ;;  %1753 = vmatpush1.bf16.msra.mxu1 %v4087_v31 }
 0x34c   :  { %1713 = vmatprep.subr.bf16.mxu0 %v4096_v63  ;;  %1754 = vmatprep.subr.bf16.mxu1 %v4101_v57 }
 0x34f   :  { %1714 = vmatpush1.bf16.msra.mxu0 %v4106_v26  ;;  %1755 = vmatpush1.bf16.msra.mxu1 %v4111_v2 }
 0x350   :  { %1715 = vmatprep.subr.bf16.mxu0 %v4120_v1  ;;  %1756 = vmatprep.subr.bf16.mxu1 %v4125_v3 }
 0x353   :  { %1716 = vmatpush1.bf16.msra.mxu0 %v4130_v58  ;;  %1757 = vmatpush1.bf16.msra.mxu1 %v4135_v59 }
 0x354   :  { %1717 = vmatprep.subr.bf16.mxu0 %v4144_v53  ;;  %1758 = vmatprep.subr.bf16.mxu1 %v4149_v60 }
 0x357   :  { %1718 = vmatpush1.bf16.msra.mxu0 %v4154_v61  ;;  %1759 = vmatpush1.bf16.msra.mxu1 %v4159_v17 }
 0x358   :  { %1719 = vmatprep.subr.bf16.mxu0 %v4007_v10  ;;  %1760 = vmatprep.subr.bf16.mxu1 %v4173_v21 }
 0x35b   :  { %1720 = vmatpush1.bf16.msra.mxu0 %v4002_v9  ;;  %1761 = vmatpush1.bf16.msra.mxu1 %v4168_v0 }
 0x35c   :  { %1721 = vmatprep.subr.bf16.mxu0 %v4012_v11  ;;  %1762 = vmatprep.subr.bf16.mxu1 %v4179_v25 }
 0x35f   :  { %1722 = vmatpush1.bf16.msra.mxu0 %v4019_v14  ;;  %1763 = vmatpush1.bf16.msra.mxu1 %v4187_v27 }
 0x360   :  { %1723 = vmatprep.subr.bf16.mxu0 %v4025_v16  ;;  %1764 = vmatprep.subr.bf16.mxu1 %v4194_v38 }
 0x363   :  { %1724 = vmatpush1.bf16.msra.mxu0 %v4031_v18  ;;  %1765 = vmatpush1.bf16.msra.mxu1 %v4201_v39 }
 0x364   :  { %2019 = vmatprep.subr.bf16.mxu0 %v4048_v19  ;;  %2060 = vmatprep.subr.bf16.mxu1 %v4053_v24 }
 0x418   :  { %v1433_v40 = vpop.f32.mrb[24].mxu0  ;;  %v1474_v41 = vpop.f32.mrb[32].mxu1 }
 0x419   :  { %v1481_v43 = vadd.f32 %v1433_v40, %v4437_v42  ;;  %v1483_v45 = vadd.f32 %v1474_v41, %v4438_v44  ;;  %v1435_v46 = vpop.f32.mrb[25].mxu0  ;;  %v1476_v47 = vpop.f32.mrb[33].mxu1 }
 0x41a   :  { %v1482_v49 = vadd.f32 %v1435_v46, %v4439_v48  ;;  %v1484_v51 = vadd.f32 %v1476_v47, %v4440_v50  ;;  %v1437_v52 = vpop.f32.mrb[26].mxu0  ;;  %v1478_v8 = vpop.f32.mrb[34].mxu1  ;;  %v4441_v50 = vld [vmem:[#allocation17_spill] sm:$0xff] }
 0x41b   :  { %v3083_v4 = vmul.f32 -1.442695, %v1481_v43  ;;  %v1438_v15 = vpop.f32.mrb[27].mxu0  ;;  %v1479_v34 = vpop.f32.mrb[35].mxu1  ;;  %v3085_v29 = vmul.f32 -1.442695, %v1483_v45 }
 0x41c   :  { %v3084_v28 = vmul.f32 -1.442695, %v1482_v49  ;;  %v4442_v52 = vld [vmem:[#allocation7_spill] sm:$0xff]  ;;  %v4443_v34 = vld [vmem:[#allocation18_spill] sm:$0xff] }
 0x41d   :  { %3445 = vpow2.f32 %v3083_v4 }
 0x41e   :  { %3447 = vpow2.f32 %v3084_v28 }
 0x41f   :  { %3449 = vtanh.f32 %v1484_v51 }
 0x420   :  { %3451 = vpow2.f32 %v3085_v29  ;;  %v4444_v29 = vld [vmem:[#allocation8_spill] sm:$0xff] }
 0x427   :  { %v3446_v32 = vpop.eup %3445 }
 0x428   :  { %v1494_v33 = vadd.f32 1.0, %v3446_v32  ;;  %v3448_v12 = vpop.eup %3447 }
 0x429   :  { %v1495_v35 = vadd.f32 1.0, %v3448_v12  ;;  %v3450_v22 = vpop.eup %3449 }
 0x42a   :  { %3453 = vrcp.f32 %v1494_v33  ;;  %v3452_v23 = vpop.eup %3451 }
 0x42b   :  { %3455 = vrcp.f32 %v1495_v35  ;;  %v1496_v42 = vadd.f32 1.0, %v3452_v23 }
 0x42d   :  { %3457 = vrcp.f32 %v1496_v42 }
 0x434   :  { %v3454_v36 = vpop.eup %3453 }
 0x435   :  { %v1505_v40 = vmul.f32 %v3454_v36, %v3450_v22  ;;  %v3456_v41 = vpop.eup %3455 }
 0x436   :  { %v1504_v43 = vmul.f32 %v3456_v41, %v4040_v20 }
 0x437   :  { %v3458_v45 = vpop.eup %3457 }
 0x438   :  { %v4214_v44 = vadd.f32 %v1505_v40, %v1504_v43 }
 0x43a   :  { %3459 = vtanh.f32 %v4214_v44 }
 0x444   :  { %v3460_v46 = vpop.eup %3459 }
 0x445   :  { %v1508_v47 = vmul.f32 %v3460_v46, %v3458_v45 }
 0x447   :  { %v1509_v48 = vpack.c.bf16 %v1508_v47, %v1508_v47 }
 0x449   :  { %1511 = vst [vmem:[#allocation3 + $0xc] sm:$0xf] %v1509_v48  ;;  %1742 = vmatmul.mubr.bf16.vlgmr.msra.gmra.mrb[28].mxu0 %v1509_v48  ;;  %1783 = vmatmul.mubr.bf16.vlgmr.msra.gmra.mrb[36].mxu1 %v1509_v48 }
 0x44a   :  { %2020 = vmatpush1.bf16.msra.mxu0 %v4058_v13  ;;  %2061 = vmatpush1.bf16.msra.mxu1 %v4063_v6 }
 0x44b   :  { %2021 = vmatprep.subr.bf16.mxu0 %v4072_v37  ;;  %2062 = vmatprep.subr.bf16.mxu1 %v4077_v30 }
 0x44c   :  { %2051 = vmatprep.mubr.bf16.mxu0 %v4435_v56  ;;  %2092 = vmatprep.mubr.bf16.mxu1 %v4435_v56 }
 0x44e   :  { %2022 = vmatpush1.bf16.msra.mxu0 %v4082_v62  ;;  %2063 = vmatpush1.bf16.msra.mxu1 %v4087_v31 }
 0x44f   :  { %2023 = vmatprep.subr.bf16.mxu0 %v4096_v63  ;;  %2064 = vmatprep.subr.bf16.mxu1 %v4101_v57 }
 0x452   :  { %2024 = vmatpush1.bf16.msra.mxu0 %v4106_v26  ;;  %2065 = vmatpush1.bf16.msra.mxu1 %v4111_v2 }
 0x453   :  { %2025 = vmatprep.subr.bf16.mxu0 %v4120_v1  ;;  %2066 = vmatprep.subr.bf16.mxu1 %v4125_v3 }
 0x456   :  { %2026 = vmatpush1.bf16.msra.mxu0 %v4130_v58  ;;  %2067 = vmatpush1.bf16.msra.mxu1 %v4135_v59 }
 0x457   :  { %2027 = vmatprep.subr.bf16.mxu0 %v4144_v53  ;;  %2068 = vmatprep.subr.bf16.mxu1 %v4149_v60 }
 0x45a   :  { %2028 = vmatpush1.bf16.msra.mxu0 %v4154_v61  ;;  %2069 = vmatpush1.bf16.msra.mxu1 %v4159_v17 }
 0x45b   :  { %2029 = vmatprep.subr.bf16.mxu0 %v4007_v10  ;;  %2070 = vmatprep.subr.bf16.mxu1 %v4173_v21 }
 0x45e   :  { %2030 = vmatpush1.bf16.msra.mxu0 %v4002_v9  ;;  %2071 = vmatpush1.bf16.msra.mxu1 %v4168_v0 }
 0x45f   :  { %2031 = vmatprep.subr.bf16.mxu0 %v4012_v11  ;;  %2072 = vmatprep.subr.bf16.mxu1 %v4179_v25 }
 0x462   :  { %2032 = vmatpush1.bf16.msra.mxu0 %v4019_v14  ;;  %2073 = vmatpush1.bf16.msra.mxu1 %v4187_v27 }
 0x463   :  { %2033 = vmatprep.subr.bf16.mxu0 %v4025_v16  ;;  %2074 = vmatprep.subr.bf16.mxu1 %v4194_v38 }
 0x466   :  { %2034 = vmatpush1.bf16.msra.mxu0 %v4031_v18  ;;  %2075 = vmatpush1.bf16.msra.mxu1 %v4201_v39 }
 0x467   :  { %2329 = vmatprep.subr.bf16.mxu0 %v4048_v19  ;;  %2370 = vmatprep.subr.bf16.mxu1 %v4053_v24 }
 0x51c   :  { %v1743_v20 = vpop.f32.mrb[28].mxu0  ;;  %v1784_v49 = vpop.f32.mrb[36].mxu1 }
 0x51d   :  { %v1791_v51 = vadd.f32 %v1743_v20, %v4441_v50  ;;  %v1793_v8 = vadd.f32 %v1784_v49, %v4442_v52  ;;  %v1745_v4 = vpop.f32.mrb[29].mxu0  ;;  %v1786_v15 = vpop.f32.mrb[37].mxu1 }
 0x51e   :  { %v1792_v28 = vadd.f32 %v1745_v4, %v4443_v34  ;;  %v1794_v32 = vadd.f32 %v1786_v15, %v4444_v29  ;;  %v1747_v33 = vpop.f32.mrb[30].mxu0  ;;  %v1788_v12 = vpop.f32.mrb[38].mxu1 }
 0x51f   :  { %v3118_v35 = vmul.f32 -1.442695, %v1791_v51  ;;  %v1748_v22 = vpop.f32.mrb[31].mxu0  ;;  %v1789_v23 = vpop.f32.mrb[39].mxu1  ;;  %v3120_v40 = vmul.f32 -1.442695, %v1793_v8 }
 0x520   :  { %v3119_v36 = vmul.f32 -1.442695, %v1792_v28  ;;  %v4446_v28 = vld [vmem:[#allocation9_spill] sm:$0xff]  ;;  %v4447_v33 = vld [vmem:[#allocation10_spill] sm:$0xff] }
 0x521   :  { %3461 = vpow2.f32 %v3118_v35 }
 0x522   :  { %3463 = vpow2.f32 %v3119_v36 }
 0x523   :  { %3465 = vtanh.f32 %v1794_v32 }
 0x524   :  { %3467 = vpow2.f32 %v3120_v40 }
 0x52b   :  { %v3462_v41 = vpop.eup %3461 }
 0x52c   :  { %v1804_v42 = vadd.f32 1.0, %v3462_v41  ;;  %v3464_v43 = vpop.eup %3463 }
 0x52d   :  { %v1805_v45 = vadd.f32 1.0, %v3464_v43  ;;  %v3466_v46 = vpop.eup %3465 }
 0x52e   :  { %3469 = vrcp.f32 %v1804_v42  ;;  %v3468_v47 = vpop.eup %3467 }
 0x52f   :  { %3471 = vrcp.f32 %v1805_v45  ;;  %v1806_v50 = vadd.f32 1.0, %v3468_v47 }
 0x531   :  { %3473 = vrcp.f32 %v1806_v50 }
 0x538   :  { %v3470_v48 = vpop.eup %3469 }
 0x539   :  { %v1815_v20 = vmul.f32 %v3470_v48, %v3466_v46  ;;  %v3472_v49 = vpop.eup %3471 }
 0x53a   :  { %v1814_v51 = vmul.f32 %v3472_v49, %v4214_v44 }
 0x53b   :  { %v3474_v8 = vpop.eup %3473 }
 0x53c   :  { %v4256_v52 = vadd.f32 %v1815_v20, %v1814_v51 }
 0x53e   :  { %3475 = vtanh.f32 %v4256_v52 }
 0x548   :  { %v3476_v4 = vpop.eup %3475 }
 0x549   :  { %v1818_v15 = vmul.f32 %v3476_v4, %v3474_v8 }
 0x54b   :  { %v1819_v34 = vpack.c.bf16 %v1818_v15, %v1818_v15 }
 0x54d   :  { %1821 = vst [vmem:[#allocation3 + $0x10] sm:$0xf] %v1819_v34  ;;  %2052 = vmatmul.mubr.bf16.vlgmr.msra.gmra.mrb[32].mxu0 %v1819_v34  ;;  %2093 = vmatmul.mubr.bf16.vlgmr.msra.gmra.mrb[40].mxu1 %v1819_v34 }
 0x54e   :  { %2330 = vmatpush1.bf16.msra.mxu0 %v4058_v13  ;;  %2371 = vmatpush1.bf16.msra.mxu1 %v4063_v6 }
 0x54f   :  { %2331 = vmatprep.subr.bf16.mxu0 %v4072_v37  ;;  %2372 = vmatprep.subr.bf16.mxu1 %v4077_v30 }
 0x550   :  { %2361 = vmatprep.mubr.bf16.mxu0 %v4435_v56  ;;  %2402 = vmatprep.mubr.bf16.mxu1 %v4435_v56 }
 0x552   :  { %2332 = vmatpush1.bf16.msra.mxu0 %v4082_v62  ;;  %2373 = vmatpush1.bf16.msra.mxu1 %v4087_v31 }
 0x553   :  { %2333 = vmatprep.subr.bf16.mxu0 %v4096_v63  ;;  %2374 = vmatprep.subr.bf16.mxu1 %v4101_v57 }
 0x556   :  { %2334 = vmatpush1.bf16.msra.mxu0 %v4106_v26  ;;  %2375 = vmatpush1.bf16.msra.mxu1 %v4111_v2 }
 0x557   :  { %2335 = vmatprep.subr.bf16.mxu0 %v4120_v1  ;;  %2376 = vmatprep.subr.bf16.mxu1 %v4125_v3 }
 0x55a   :  { %2336 = vmatpush1.bf16.msra.mxu0 %v4130_v58  ;;  %2377 = vmatpush1.bf16.msra.mxu1 %v4135_v59 }
 0x55b   :  { %2337 = vmatprep.subr.bf16.mxu0 %v4144_v53  ;;  %2378 = vmatprep.subr.bf16.mxu1 %v4149_v60 }
 0x55e   :  { %2338 = vmatpush1.bf16.msra.mxu0 %v4154_v61  ;;  %2379 = vmatpush1.bf16.msra.mxu1 %v4159_v17 }
 0x55f   :  { %2339 = vmatprep.subr.bf16.mxu0 %v4007_v10  ;;  %2380 = vmatprep.subr.bf16.mxu1 %v4173_v21 }
 0x562   :  { %2340 = vmatpush1.bf16.msra.mxu0 %v4002_v9  ;;  %2381 = vmatpush1.bf16.msra.mxu1 %v4168_v0 }
 0x563   :  { %2341 = vmatprep.subr.bf16.mxu0 %v4012_v11  ;;  %2382 = vmatprep.subr.bf16.mxu1 %v4179_v25  ;;  %v4445_v11 = vld [vmem:[#allocation19_spill] sm:$0xff] }
 0x566   :  { %2342 = vmatpush1.bf16.msra.mxu0 %v4019_v14  ;;  %2383 = vmatpush1.bf16.msra.mxu1 %v4187_v27 }
 0x567   :  { %2343 = vmatprep.subr.bf16.mxu0 %v4025_v16  ;;  %2384 = vmatprep.subr.bf16.mxu1 %v4194_v38 }
 0x56a   :  { %2344 = vmatpush1.bf16.msra.mxu0 %v4031_v18  ;;  %2385 = vmatpush1.bf16.msra.mxu1 %v4201_v39 }
 0x56b   :  { %2639 = vmatprep.subr.bf16.mxu0 %v4048_v19  ;;  %2680 = vmatprep.subr.bf16.mxu1 %v4053_v24 }
 0x620   :  { %v2053_v9 = vpop.f32.mrb[32].mxu0  ;;  %v2094_v10 = vpop.f32.mrb[40].mxu1 }
 0x621   :  { %v2101_v44 = vadd.f32 %v2053_v9, %v4445_v11  ;;  %v2103_v14 = vadd.f32 %v2094_v10, %v4446_v28  ;;  %v2055_v29 = vpop.f32.mrb[33].mxu0  ;;  %v2096_v32 = vpop.f32.mrb[41].mxu1 }
 0x622   :  { %v2102_v16 = vadd.f32 %v2055_v29, %v3914_v5  ;;  %v2104_v12 = vadd.f32 %v2096_v32, %v4447_v33  ;;  %v2057_v35 = vpop.f32.mrb[34].mxu0  ;;  %v2098_v18 = vpop.f32.mrb[42].mxu1 }
 0x623   :  { %v3153_v22 = vmul.f32 -1.442695, %v2101_v44  ;;  %v2058_v23 = vpop.f32.mrb[35].mxu0  ;;  %v2099_v36 = vpop.f32.mrb[43].mxu1  ;;  %v3155_v24 = vmul.f32 -1.442695, %v2103_v14 }
 0x624   :  { %v3154_v19 = vmul.f32 -1.442695, %v2102_v16  ;;  %v3387_v35 = vld [vmem:[%s4413_s4 + $0x8] sm:$0xff]   ;;  %v3386_v18 = vld [vmem:[#allocation3] sm:$0xff]   ;;  %v3389_v23 = vld [vmem:[%s4413_s4 + $0x18] sm:$0xff]  }
 0x625   :  { %3477 = vpow2.f32 %v3153_v22  ;;  %v3388_v22 = vld [vmem:[%s4413_s4 + $0x10] sm:$0xff]   ;;  %v3390_v36 = vld [vmem:[%s4413_s4 + $0x20] sm:$0xff]  }
 0x626   :  { %3479 = vpow2.f32 %v3154_v19  ;;  %v3391_v19 = vld [vmem:[%s4413_s4 + $0x28] sm:$0xff]  }
 0x627   :  { %3481 = vtanh.f32 %v2104_v12 }
 0x628   :  { %3483 = vpow2.f32 %v3155_v24  ;;  %v3392_v24 = vld [vmem:[%s4413_s4 + $0x30] sm:$0xff]  }
 0x62f   :  { %v3478_v40 = vpop.eup %3477 }
 0x630   :  { %v2114_v41 = vadd.f32 1.0, %v3478_v40  ;;  %v3480_v42 = vpop.eup %3479  ;;  %v3393_v40 = vld [vmem:[%s4413_s4 + $0x38] sm:$0xff]  }
 0x631   :  { %v2115_v43 = vadd.f32 1.0, %v3480_v42  ;;  %v3482_v5 = vpop.eup %3481 }
 0x632   :  { %3485 = vrcp.f32 %v2114_v41  ;;  %v3484_v45 = vpop.eup %3483  ;;  %v3394_v41 = vld [vmem:[#allocation3 + $0x8] sm:$0xff]  }
 0x633   :  { %3487 = vrcp.f32 %v2115_v43  ;;  %v2116_v20 = vadd.f32 1.0, %v3484_v45 }
 0x635   :  { %3489 = vrcp.f32 %v2116_v20 }
 0x63c   :  { %v3486_v46 = vpop.eup %3485 }
 0x63d   :  { %v2125_v47 = vmul.f32 %v3486_v46, %v3482_v5  ;;  %v3488_v48 = vpop.eup %3487  ;;  %v4450_v46 = vld [vmem:[#allocation15_spill] sm:$0xff] }
 0x63e   :  { %v2124_v49 = vmul.f32 %v3488_v48, %v4256_v52 }
 0x63f   :  { %v3490_v51 = vpop.eup %3489 }
 0x640   :  { %v4298_v50 = vadd.f32 %v2125_v47, %v2124_v49  ;;  %v4451_v49 = vld [vmem:[#allocation20_spill] sm:$0xff] }
 0x642   :  { %3491 = vtanh.f32 %v4298_v50 }
 0x64c   :  { %v3492_v8 = vpop.eup %3491 }
 0x64d   :  { %v2128_v4 = vmul.f32 %v3492_v8, %v3490_v51  ;;  %v4452_v51 = vld [vmem:[#allocation16_spill] sm:$0xff] }
 0x64f   :  { %v2129_v15 = vpack.c.bf16 %v2128_v4, %v2128_v4 }
 0x651   :  { %2131 = vst [vmem:[#allocation3 + $0x14] sm:$0xf] %v2129_v15  ;;  %2362 = vmatmul.mubr.bf16.vlgmr.msra.gmra.mrb[36].mxu0 %v2129_v15  ;;  %2403 = vmatmul.mubr.bf16.vlgmr.msra.gmra.mrb[44].mxu1 %v2129_v15 }
 0x652   :  { %2640 = vmatpush1.bf16.msra.mxu0 %v4058_v13  ;;  %2681 = vmatpush1.bf16.msra.mxu1 %v4063_v6  ;;  %v3378_v13 = vld [vmem:[%s4411_s2 + $0xa4] ss:$16 sps:$4 sm:$0xff]   ;;  %v3379_v6 = vld [vmem:[%s4411_s2 + $0xc0] ss:$16 sps:$4 sm:$0xff]  }
 0x653   :  { %2641 = vmatprep.subr.bf16.mxu0 %v4072_v37  ;;  %2682 = vmatprep.subr.bf16.mxu1 %v4077_v30  ;;  %v3381_v37 = vld [vmem:[%s4411_s2 + $0xc4] ss:$16 sps:$4 sm:$0xff]  }
 0x654   :  { %2671 = vmatprep.mubr.bf16.mxu0 %v4435_v56  ;;  %2712 = vmatprep.mubr.bf16.mxu1 %v4435_v56  ;;  %v3376_v56 = vld [vmem:[%s4411_s2 + $0xa0] ss:$16 sps:$4 sm:$0xff]   ;;  %v3384_v30 = vld [vmem:[%s4411_s2 + $0xe4] ss:$16 sps:$4 sm:$0xff]  }
 0x656   :  { %2642 = vmatpush1.bf16.msra.mxu0 %v4082_v62  ;;  %2683 = vmatpush1.bf16.msra.mxu1 %v4087_v31  ;;  %v3382_v62 = vld [vmem:[%s4411_s2 + $0xe0] ss:$16 sps:$4 sm:$0xff]  }
 0x657   :  { %2643 = vmatprep.subr.bf16.mxu0 %v4096_v63  ;;  %2684 = vmatprep.subr.bf16.mxu1 %v4101_v57  ;;  %v3385_v31 = vld [vmem:[%s4413_s4] sm:$0xff]  }
 0x658   :  { %v3395_v42 = vld [vmem:[#allocation3 + $0x10] sm:$0xff]  }
 0x65a   :  { %2644 = vmatpush1.bf16.msra.mxu0 %v4106_v26  ;;  %2685 = vmatpush1.bf16.msra.mxu1 %v4111_v2  ;;  %v4448_v2 = vld [vmem:[#allocation12_spill] sm:$0xff] }
 0x65b   :  { %2645 = vmatprep.subr.bf16.mxu0 %v4120_v1  ;;  %2686 = vmatprep.subr.bf16.mxu1 %v4125_v3 }
 0x65e   :  { %2646 = vmatpush1.bf16.msra.mxu0 %v4130_v58  ;;  %2687 = vmatpush1.bf16.msra.mxu1 %v4135_v59 }
 0x65f   :  { %2647 = vmatprep.subr.bf16.mxu0 %v4144_v53  ;;  %2688 = vmatprep.subr.bf16.mxu1 %v4149_v60  ;;  %v4449_v53 = vld [vmem:[#allocation14_spill] sm:$0xff] }
 0x662   :  { %2648 = vmatpush1.bf16.msra.mxu0 %v4154_v61  ;;  %2689 = vmatpush1.bf16.msra.mxu1 %v4159_v17 }
 0x663   :  { %2690 = vmatprep.subr.bf16.mxu1 %v4173_v21  ;;  %2649 = vmatprep.subr.bf16.mxu0 %v3378_v13 }
 0x666   :  { %2691 = vmatpush1.bf16.msra.mxu1 %v4168_v0  ;;  %2650 = vmatpush1.bf16.msra.mxu0 %v3376_v56 }
 0x667   :  { %2692 = vmatprep.subr.bf16.mxu1 %v4179_v25  ;;  %2651 = vmatprep.subr.bf16.mxu0 %v3381_v37 }
 0x66a   :  { %2693 = vmatpush1.bf16.msra.mxu1 %v4187_v27  ;;  %2652 = vmatpush1.bf16.msra.mxu0 %v3379_v6 }
 0x66b   :  { %2694 = vmatprep.subr.bf16.mxu1 %v4194_v38  ;;  %2653 = vmatprep.subr.bf16.mxu0 %v3384_v30 }
 0x66e   :  { %2695 = vmatpush1.bf16.msra.mxu1 %v4201_v39  ;;  %2654 = vmatpush1.bf16.msra.mxu0 %v3382_v62 }
 0x66f   :  { %3251 = vmatprep.subr.bf16.mxu0 %v3385_v31 }
 0x724   :  { %v2363_v63 = vpop.f32.mrb[36].mxu0  ;;  %v2404_v57 = vpop.f32.mrb[44].mxu1 }
 0x725   :  { %v2411_v26 = vadd.f32 %v2363_v63, %v3916_v7  ;;  %v2413_v1 = vadd.f32 %v2404_v57, %v4448_v2  ;;  %v2365_v3 = vpop.f32.mrb[37].mxu0  ;;  %v2406_v58 = vpop.f32.mrb[45].mxu1 }
 0x726   :  { %v2412_v59 = vadd.f32 %v2365_v3, %v3918_v54  ;;  %v2414_v60 = vadd.f32 %v2406_v58, %v4449_v53  ;;  %v2367_v61 = vpop.f32.mrb[38].mxu0  ;;  %v2408_v17 = vpop.f32.mrb[46].mxu1 }
 0x727   :  { %v3188_v0 = vmul.f32 -1.442695, %v2411_v26  ;;  %v2368_v21 = vpop.f32.mrb[39].mxu0  ;;  %v2409_v25 = vpop.f32.mrb[47].mxu1  ;;  %v3190_v38 = vmul.f32 -1.442695, %v2413_v1 }
 0x728   :  { %v3189_v27 = vmul.f32 -1.442695, %v2412_v59  ;;  %v3226_v59 = vld [vmem:[%s4414_s5] ss:$0 sm:$0xff] }
 0x729   :  { %3493 = vpow2.f32 %v3188_v0 }
 0x72a   :  { %3495 = vpow2.f32 %v3189_v27 }
 0x72b   :  { %3497 = vtanh.f32 %v2414_v60 }
 0x72c   :  { %3499 = vpow2.f32 %v3190_v38 }
 0x733   :  { %v3494_v39 = vpop.eup %3493 }
 0x734   :  { %v2424_v52 = vadd.f32 1.0, %v3494_v39  ;;  %v3496_v7 = vpop.eup %3495 }
 0x735   :  { %v2425_v34 = vadd.f32 1.0, %v3496_v7  ;;  %v3498_v54 = vpop.eup %3497 }
 0x736   :  { %3501 = vrcp.f32 %v2424_v52  ;;  %v3500_v9 = vpop.eup %3499 }
 0x737   :  { %3503 = vrcp.f32 %v2425_v34  ;;  %v2426_v28 = vadd.f32 1.0, %v3500_v9 }
 0x739   :  { %3505 = vrcp.f32 %v2426_v28 }
 0x740   :  { %v3502_v10 = vpop.eup %3501 }
 0x741   :  { %v2435_v11 = vmul.f32 %v3502_v10, %v3498_v54  ;;  %v3504_v44 = vpop.eup %3503 }
 0x742   :  { %v2434_v14 = vmul.f32 %v3504_v44, %v4298_v50 }
 0x743   :  { %v3506_v32 = vpop.eup %3505 }
 0x744   :  { %v4353_v29 = vadd.f32 %v2435_v11, %v2434_v14 }
 0x746   :  { %3507 = vtanh.f32 %v4353_v29 }
 0x750   :  { %v3508_v16 = vpop.eup %3507 }
 0x751   :  { %v2438_v33 = vmul.f32 %v3508_v16, %v3506_v32 }
 0x753   :  { %v2439_v12 = vpack.c.bf16 %v2438_v33, %v2438_v33 }
 0x755   :  { %2441 = vst [vmem:[#allocation3 + $0x18] sm:$0xf] %v2439_v12  ;;  %2672 = vmatmul.mubr.bf16.vlgmr.msra.gmra.mrb[40].mxu0 %v2439_v12  ;;  %2713 = vmatmul.mubr.bf16.vlgmr.msra.gmra.mrb[48].mxu1 %v2439_v12 }
 0x756   :  { %3252 = vmatpush3.bf16.msra.mxu0 %v3385_v31  ;;  %3267 = vmatprep.mubr.bf16.mxu0 %v3386_v18 }
 0x757   :  { %3253 = vmatprep.subr.bf16.mxu0 %v3387_v35 }
 0x75a   :  { %3254 = vmatpush3.bf16.msra.mxu0 %v3387_v35 }
 0x75b   :  { %3255 = vmatprep.subr.bf16.mxu0 %v3388_v22 }
 0x75e   :  { %3256 = vmatpush3.bf16.msra.mxu0 %v3388_v22 }
 0x75f   :  { %3257 = vmatprep.subr.bf16.mxu0 %v3389_v23 }
 0x762   :  { %3258 = vmatpush3.bf16.msra.mxu0 %v3389_v23 }
 0x763   :  { %3259 = vmatprep.subr.bf16.mxu0 %v3390_v36 }
 0x766   :  { %3260 = vmatpush3.bf16.msra.mxu0 %v3390_v36 }
 0x767   :  { %3261 = vmatprep.subr.bf16.mxu0 %v3391_v19 }
 0x76a   :  { %3262 = vmatpush3.bf16.msra.mxu0 %v3391_v19 }
 0x76b   :  { %3263 = vmatprep.subr.bf16.mxu0 %v3392_v24 }
 0x76e   :  { %3264 = vmatpush3.bf16.msra.mxu0 %v3392_v24 }
 0x76f   :  { %3265 = vmatprep.subr.bf16.mxu0 %v3393_v40 }
 0x772   :  { %3266 = vmatpush3.bf16.msra.mxu0 %v3393_v40 }
 0x775   :  { %3268 = vmatmul.mubr.bf16.vlgmr.msra.gmra.mrb[44].mxu0 %v3394_v41 }
 0x776   :  { %3271 = vmatprep.mubr.bf16.mxu0 %v3395_v42 }
 0x828   :  { %v2673_v43 = vpop.f32.mrb[40].mxu0  ;;  %v2714_v5 = vpop.f32.mrb[48].mxu1 }
 0x829   :  { %v2721_v45 = vadd.f32 %v2673_v43, %v3920_v55  ;;  %v2723_v47 = vadd.f32 %v2714_v5, %v4450_v46  ;;  %v2675_v48 = vpop.f32.mrb[41].mxu0  ;;  %v2716_v20 = vpop.f32.mrb[49].mxu1 }
 0x82a   :  { %v2722_v50 = vadd.f32 %v2675_v48, %v4451_v49  ;;  %v2724_v8 = vadd.f32 %v2716_v20, %v4452_v51  ;;  %v2677_v4 = vpop.f32.mrb[42].mxu0  ;;  %v2718_v15 = vpop.f32.mrb[50].mxu1 }
 0x82b   :  { %v3223_v56 = vmul.f32 -1.442695, %v2721_v45  ;;  %v2678_v13 = vpop.f32.mrb[43].mxu0  ;;  %v2719_v6 = vpop.f32.mrb[51].mxu1  ;;  %v3225_v30 = vmul.f32 -1.442695, %v2723_v47 }
 0x82c   :  { %v3224_v37 = vmul.f32 -1.442695, %v2722_v50 }
 0x82d   :  { %3509 = vpow2.f32 %v3223_v56 }
 0x82e   :  { %3511 = vpow2.f32 %v3224_v37 }
 0x82f   :  { %3513 = vtanh.f32 %v2724_v8 }
 0x830   :  { %3515 = vpow2.f32 %v3225_v30 }
 0x837   :  { %v3510_v62 = vpop.eup %3509 }
 0x838   :  { %v2734_v31 = vadd.f32 1.0, %v3510_v62  ;;  %v3512_v55 = vpop.eup %3511 }
 0x839   :  { %v2735_v63 = vadd.f32 1.0, %v3512_v55  ;;  %v3514_v57 = vpop.eup %3513 }
 0x83a   :  { %3517 = vrcp.f32 %v2734_v31  ;;  %v3516_v26 = vpop.eup %3515 }
 0x83b   :  { %3519 = vrcp.f32 %v2735_v63  ;;  %v2736_v58 = vadd.f32 1.0, %v3516_v26 }
 0x83d   :  { %3521 = vrcp.f32 %v2736_v58 }
 0x844   :  { %v3518_v2 = vpop.eup %3517 }
 0x845   :  { %v2745_v1 = vmul.f32 %v3518_v2, %v3514_v57  ;;  %v3520_v3 = vpop.eup %3519 }
 0x846   :  { %v2744_v53 = vmul.f32 %v3520_v3, %v4353_v29 }
 0x847   :  { %v3522_v52 = vpop.eup %3521 }
 0x848   :  { %v3269_v60 = vpop.f32.mrb[44].mxu0  ;;  %v2746_v61 = vadd.f32 %v2745_v1, %v2744_v53 }
 0x849   :  { %v2898_v17 = vadd.f32 %v3269_v60, %v3226_v59  ;;  %v2889_v0 = vpop.f32.mrb[45].mxu0 }
 0x84a   :  { %v2890_v21 = vadd.f32 %v3226_v59, %v2889_v0  ;;  %v3270_v25 = vpop.f32.mrb[46].mxu0  ;;  %3523 = vtanh.f32 %v2746_v61 }
 0x84b   :  { %2922 = vst [vmem:[%s4415_s6 + $0x10] sm:$0xff] %v2898_v17  ;;  %v2901_v27 = vadd.f32 %v3270_v25, %v3226_v59  ;;  %v2892_v38 = vpop.f32.mrb[47].mxu0 }
 0x84c   :  { %2920 = vst [vmem:[%s4415_s6] sm:$0xff] %v2890_v21  ;;  %v2893_v39 = vadd.f32 %v3226_v59, %v2892_v38 }
 0x84d   :  { %2923 = vst [vmem:[%s4415_s6 + $0x18] sm:$0xff] %v2901_v27 }
 0x84e   :  { %2921 = vst [vmem:[%s4415_s6 + $0x8] sm:$0xff] %v2893_v39 }
 0x854   :  { %v3524_v7 = vpop.eup %3523 }
 0x855   :  { %v2748_v34 = vmul.f32 %v3524_v7, %v3522_v52 }
 0x857   :  { %v2749_v54 = vpack.c.bf16 %v2748_v34, %v2748_v34 }
 0x859   :  { %2751 = vst [vmem:[#allocation3 + $0x1c] sm:$0xf] %v2749_v54 }
 0x860   :  { %v3396_v9 = vld [vmem:[#allocation3 + $0x18] sm:$0xff]  }
 0x861   :  { %3272 = vmatmul.mubr.bf16.gmra.mrb[48].mxu0 %v3396_v9 }
 0x934   :  { %v3273_v10 = vpop.f32.mrb[48].mxu0 }
 0x935   :  { %v2914_v11 = vadd.f32 %v3273_v10, %v3226_v59  ;;  %v2905_v44 = vpop.f32.mrb[49].mxu0 }
 0x936   :  { %v2906_v28 = vadd.f32 %v3226_v59, %v2905_v44  ;;  %v3274_v14 = vpop.f32.mrb[50].mxu0 }
 0x937   :  { %2926 = vst [vmem:[%s4415_s6 + $0x30] sm:$0xff] %v2914_v11  ;;  %v2917_v29 = vadd.f32 %v3274_v14, %v3226_v59  ;;  %v2908_v32 = vpop.f32.mrb[51].mxu0 }
 0x938   :  { %2924 = vst [vmem:[%s4415_s6 + $0x20] sm:$0xff] %v2906_v28  ;;  %v2909_v16 = vadd.f32 %v3226_v59, %v2908_v32 }
 0x939   :  { %2927 = vst [vmem:[%s4415_s6 + $0x38] sm:$0xff] %v2917_v29 }
 0x93a   :  { %2925 = vst [vmem:[%s4415_s6 + $0x28] sm:$0xff] %v2909_v16 }

</bundles_post_ra>
